<compile_context>
chip_gen: v7x
topology: tpu7x:2x2x1
jax: 0.10.0
libtpu: 0.0.40
codegen_flags: <defaults>
</compile_context>

<pallas_src>
import functools

import jax
import jax.numpy as jnp
from jax.experimental import pallas as pl
from jax.experimental.pallas import tpu as pltpu


# ----------------------------------------------------------------------------
# Kernel: grid = (direction, time_block).  (h, c) carried in resident hn/cn
# output blocks; gates_x for the whole time block computed with one MXU matmul.
# ----------------------------------------------------------------------------
def _bilstm_kernel(x_ref, wih_ref, whh_ref, bias_ref,
                   out_ref, hn_ref, cn_ref, gx_ref, *,
                   hidden, t_blk, seq_len, needs_mask):
    d = pl.program_id(0)          # 0 = forward, 1 = reverse
    j = pl.program_id(1)          # sequential time-block counter
    nb = pl.num_programs(1)

    @pl.when(j == 0)
    def _init():
        hn_ref[...] = jnp.zeros_like(hn_ref)
        cn_ref[...] = jnp.zeros_like(cn_ref)

    w_ih = wih_ref[0]             # (I_pad, 4*H_pad) bf16, resident
    w_hh = whh_ref[0]             # (H_pad, 4*H_pad) bf16, resident
    bias = bias_ref[0]            # (1, 4*H_pad) f32

    tb, b, ip = x_ref.shape       # (t_blk, B_pad, I_pad), static
    g = 4 * hidden

    # Fused, time-parallel input projection for this block: one MXU matmul.
    gx_ref[...] = (
        jnp.dot(x_ref[...].reshape(tb * b, ip), w_ih,
                preferred_element_type=jnp.float32) + bias
    ).reshape(tb, b, g)

    # Global time index of local step 0 of this block (original time order).
    t_base = (d * (nb - 1) + (1 - 2 * d) * j) * t_blk

    def fast_sigmoid(z):
        # one EUP op (tanh) + VPU fma vs. exp + reciprocal for jax.nn.sigmoid
        return 0.5 * jnp.tanh(0.5 * z) + 0.5

    def step(it, carry):
        h, c = carry
        # branch-free local step: forward walks 0..t_blk-1, reverse walks back
        s = d * (t_blk - 1) + (1 - 2 * d) * it
        gates = gx_ref[s] + jnp.dot(h.astype(w_hh.dtype), w_hh,
                                    preferred_element_type=jnp.float32)
        i_g = fast_sigmoid(gates[:, 0 * hidden:1 * hidden])
        f_g = fast_sigmoid(gates[:, 1 * hidden:2 * hidden])
        g_g = jnp.tanh(gates[:, 2 * hidden:3 * hidden])
        o_g = fast_sigmoid(gates[:, 3 * hidden:4 * hidden])
        c_new = f_g * c + i_g * g_g
        h_new = o_g * jnp.tanh(c_new)
        if needs_mask:
            # freeze state on padded timesteps (only generated if T was padded)
            valid = (t_base + s) < seq_len
            c_new = jnp.where(valid, c_new, c)
            h_new = jnp.where(valid, h_new, h)
        out_ref[s] = h_new        # local index == original time order
        return h_new, c_new

    h, c = jax.lax.fori_loop(0, t_blk, step, (hn_ref[0], cn_ref[0]),
                             unroll=min(8, t_blk))
    hn_ref[0] = h
    cn_ref[0] = c


# ----------------------------------------------------------------------------
# Wrapper helpers
# ----------------------------------------------------------------------------
def _round_up(v, m):
    return ((v + m - 1) // m) * m


def _pad_gate_mat(w, H, H_pad, in_dim, in_pad):
    """(4H, in_dim) -> (4*H_pad, in_pad), padding each gate block separately."""
    w = w.reshape(4, H, in_dim)
    w = jnp.pad(w, ((0, 0), (0, H_pad - H), (0, in_pad - in_dim)))
    return w.reshape(4 * H_pad, in_pad)


def _pad_gate_vec(b, H, H_pad):
    b = b.reshape(4, H)
    b = jnp.pad(b, ((0, 0), (0, H_pad - H)))
    return b.reshape(4 * H_pad)


def _pick_time_block(T, B_pad, H_pad, G_pad, I_pad,
                     budget_bytes=8 << 20, max_steps=512):
    """Largest time block whose time-dependent VMEM buffers fit the budget,
    then the block size that minimizes T padding."""
    per_step = (B_pad * G_pad * 4          # gx scratch (f32)
                + 2 * B_pad * I_pad * 2    # x block, double-buffered bf16
                + 2 * B_pad * H_pad * 4)   # out block, double-buffered f32
    cap = max(1, min(max_steps, T, budget_bytes // per_step))
    nb = -(-T // cap)                       # smallest #blocks with block <= cap
    return -(-T // nb)


def _vmem_bytes(t_blk, B_pad, H_pad, G_pad, I_pad):
    bf16, f32 = 2, 4
    return (2 * t_blk * B_pad * I_pad * bf16      # x (double buffer)
            + 2 * I_pad * G_pad * bf16            # W_ih^T
            + 2 * H_pad * G_pad * bf16            # W_hh^T
            + 2 * G_pad * f32                     # bias
            + 2 * t_blk * B_pad * H_pad * f32     # out (double buffer)
            + 4 * B_pad * H_pad * f32             # hn, cn
            + t_blk * B_pad * G_pad * f32)        # gx scratch


# ----------------------------------------------------------------------------
# Forward pass matching torch.nn.LSTM(input, hidden, bidirectional=True)
# ----------------------------------------------------------------------------
def ori_bilstm_forward(x, params):
    """x: (T, B, I) float32 time-major.
    Returns (output (T,B,2H), hn (2,B,H), cn (2,B,H))."""
    T, B, I = x.shape
    H = params["w_hh_l0"].shape[1]

    B_pad = _round_up(B, 8)
    H_pad = _round_up(H, 128)
    I_pad = _round_up(I, 128)
    G_pad = 4 * H_pad

    t_blk = _pick_time_block(T, B_pad, H_pad, G_pad, I_pad)
    T_pad = _round_up(T, t_blk)
    nb = T_pad // t_blk

    # --- pad / cast inputs & weights (layout plumbing in XLA, not the kernel) ---
    x_p = jnp.pad(x, ((0, T_pad - T), (0, B_pad - B), (0, I_pad - I))
                  ).astype(jnp.bfloat16)                                   # (T_pad,B_pad,I_pad)

    w_ih_t = jnp.stack([
        _pad_gate_mat(params["w_ih_l0"], H, H_pad, I, I_pad).T,
        _pad_gate_mat(params["w_ih_l0_rev"], H, H_pad, I, I_pad).T,
    ]).astype(jnp.bfloat16)                                                # (2,I_pad,G_pad)
    w_hh_t = jnp.stack([
        _pad_gate_mat(params["w_hh_l0"], H, H_pad, H, H_pad).T,
        _pad_gate_mat(params["w_hh_l0_rev"], H, H_pad, H, H_pad).T,
    ]).astype(jnp.bfloat16)                                                # (2,H_pad,G_pad)
    bias = jnp.stack([
        _pad_gate_vec(params["b_ih_l0"] + params["b_hh_l0"], H, H_pad),
        _pad_gate_vec(params["b_ih_l0_rev"] + params["b_hh_l0_rev"], H, H_pad),
    ]).astype(jnp.float32).reshape(2, 1, G_pad)                            # (2,1,G_pad)

    def time_block(d, j):
        # forward (d=0): block j ; reverse (d=1): block nb-1-j (branch-free)
        return d * (nb - 1) + (1 - 2 * d) * j

    grid_spec = pltpu.PrefetchScalarGridSpec(
        num_scalar_prefetch=0,
        grid=(2, nb),
        in_specs=[
            pl.BlockSpec((t_blk, B_pad, I_pad), lambda d, j: (time_block(d, j), 0, 0)),
            pl.BlockSpec((1, I_pad, G_pad), lambda d, j: (d, 0, 0)),   # W_ih^T resident
            pl.BlockSpec((1, H_pad, G_pad), lambda d, j: (d, 0, 0)),   # W_hh^T resident
            pl.BlockSpec((1, 1, G_pad), lambda d, j: (d, 0, 0)),       # bias
        ],
        out_specs=[
            # both directions write into one (T,B,2H) slab; d picks the H half
            pl.BlockSpec((t_blk, B_pad, H_pad), lambda d, j: (time_block(d, j), 0, d)),
            pl.BlockSpec((1, B_pad, H_pad), lambda d, j: (d, 0, 0)),   # hn (carried)
            pl.BlockSpec((1, B_pad, H_pad), lambda d, j: (d, 0, 0)),   # cn (carried)
        ],
        scratch_shapes=[pltpu.VMEM((t_blk, B_pad, G_pad), jnp.float32)],
    )

    needed = _vmem_bytes(t_blk, B_pad, H_pad, G_pad, I_pad)
    vmem_limit = int(min(48 * 1024 * 1024, max(16 * 1024 * 1024, 2 * needed)))

    out_p, hn_p, cn_p = pl.pallas_call(
        functools.partial(_bilstm_kernel, hidden=H_pad, t_blk=t_blk,
                          seq_len=T, needs_mask=(T_pad != T)),
        grid_spec=grid_spec,
        out_shape=[
            jax.ShapeDtypeStruct((T_pad, B_pad, 2 * H_pad), jnp.float32),
            jax.ShapeDtypeStruct((2, B_pad, H_pad), jnp.float32),
            jax.ShapeDtypeStruct((2, B_pad, H_pad), jnp.float32),
        ],
        compiler_params=pltpu.CompilerParams(
            dimension_semantics=("parallel", "arbitrary"),
            vmem_limit_bytes=vmem_limit,
        ),
    )(x_p, w_ih_t, w_hh_t, bias)

    if H == H_pad:
        output = out_p[:T, :B, :]
    else:
        output = jnp.concatenate(
            [out_p[:T, :B, :H], out_p[:T, :B, H_pad:H_pad + H]], axis=-1)
    hn = hn_p[:, :B, :H]
    cn = cn_p[:, :B, :H]
    return output, hn, cn


# ----------------------------------------------------------------------------
# Pure-JAX reference (lax.scan) with the same bf16-operand / f32-accumulate math
# ----------------------------------------------------------------------------
def _lstm_ref_single(x, w_ih, w_hh, b_ih, b_hh, reverse):
    T, B, _ = x.shape
    H = w_hh.shape[1]
    gx = jnp.dot(x.astype(jnp.bfloat16).reshape(T * B, -1),
                 w_ih.astype(jnp.bfloat16).T,
                 preferred_element_type=jnp.float32).reshape(T, B, -1)
    gx = gx + (b_ih + b_hh).astype(jnp.float32)
    w_hh_t = w_hh.astype(jnp.bfloat16).T
    xs = gx[::-1] if reverse else gx

    def step(carry, g):
        h, c = carry
        gates = g + jnp.dot(h.astype(jnp.bfloat16), w_hh_t,
                            preferred_element_type=jnp.float32)
        i = jax.nn.sigmoid(gates[:, :H])
        f = jax.nn.sigmoid(gates[:, H:2 * H])
        gg = jnp.tanh(gates[:, 2 * H:3 * H])
        o = jax.nn.sigmoid(gates[:, 3 * H:])
        c = f * c + i * gg
        h = o * jnp.tanh(c)
        return (h, c), h

    init = (jnp.zeros((B, H), jnp.float32), jnp.zeros((B, H), jnp.float32))
    (hT, cT), hs = jax.lax.scan(step, init, xs)
    if reverse:
        hs = hs[::-1]
    return hs, hT, cT


def ori_bilstm_ref(x, params):
    out_f, hn_f, cn_f = _lstm_ref_single(
        x, params["w_ih_l0"], params["w_hh_l0"],
        params["b_ih_l0"], params["b_hh_l0"], reverse=False)
    out_r, hn_r, cn_r = _lstm_ref_single(
        x, params["w_ih_l0_rev"], params["w_hh_l0_rev"],
        params["b_ih_l0_rev"], params["b_hh_l0_rev"], reverse=True)
    return (jnp.concatenate([out_f, out_r], axis=-1),
            jnp.stack([hn_f, hn_r], axis=0),
            jnp.stack([cn_f, cn_r], axis=0))


# ----------------------------------------------------------------------------
# Deterministic parameter init (PyTorch LSTM init: U(-1/sqrt(H), 1/sqrt(H)))
# ----------------------------------------------------------------------------
def init_params(key, input_size, hidden_size):
    k = 1.0 / jnp.sqrt(jnp.float32(hidden_size))
    G = 4 * hidden_size
    keys = jax.random.split(key, 8)

    def u(kk, shape):
        return jax.random.uniform(kk, shape, jnp.float32, minval=-k, maxval=k)

    return {
        "w_ih_l0":     u(keys[0], (G, input_size)),
        "w_hh_l0":     u(keys[1], (G, hidden_size)),
        "b_ih_l0":     u(keys[2], (G,)),
        "b_hh_l0":     u(keys[3], (G,)),
        "w_ih_l0_rev": u(keys[4], (G, input_size)),
        "w_hh_l0_rev": u(keys[5], (G, hidden_size)),
        "b_ih_l0_rev": u(keys[6], (G,)),
        "b_hh_l0_rev": u(keys[7], (G,)),
    }


if __name__ == "__main__":
    SEQ, BATCH, INPUT, HIDDEN = 8, 4, 16, 32

    key = jax.random.PRNGKey(0)
    k_x, k_p = jax.random.split(key)
    x = jax.random.normal(k_x, (SEQ, BATCH, INPUT), dtype=jnp.float32)
    params = init_params(k_p, INPUT, HIDDEN)

    output, hn, cn = jax.block_until_ready(ori_bilstm_forward(x, params))

    out_ref, hn_ref, cn_ref = ori_bilstm_ref(x, params)
    assert output.shape == (SEQ, BATCH, 2 * HIDDEN)
    assert hn.shape == (2, BATCH, HIDDEN) and cn.shape == (2, BATCH, HIDDEN)
    assert jnp.allclose(output, out_ref, atol=5e-3, rtol=5e-3)
    assert jnp.allclose(hn, hn_ref, atol=5e-3, rtol=5e-3)
    assert jnp.allclose(cn, cn_ref, atol=5e-3, rtol=5e-3)

    print("KERNEL_OK")
</pallas_src>

<mosaic_0001>
module attributes {stable_mosaic.version = 11 : i64} {
  func.func @_bilstm_kernel(%arg0: i32, %arg1: i32, %arg2: memref<8x8x128xbf16, #tpu.memory_space<vmem>>, %arg3: memref<1x128x512xbf16, #tpu.memory_space<vmem>>, %arg4: memref<1x128x512xbf16, #tpu.memory_space<vmem>>, %arg5: memref<1x1x512xf32, #tpu.memory_space<vmem>>, %arg6: memref<8x8x128xf32, #tpu.memory_space<vmem>>, %arg7: memref<1x8x128xf32, #tpu.memory_space<vmem>>, %arg8: memref<1x8x128xf32, #tpu.memory_space<vmem>>, %arg9: memref<8x8x512xf32, #tpu.memory_space<vmem>>) attributes {dimension_semantics = [#tpu.dimension_semantics<parallel>, #tpu.dimension_semantics<arbitrary>], iteration_bounds = array<i64: 2, 1>, scalar_prefetch = 0 : i64, scratch_operands = 1 : i64, tpu.core_type = #tpu.core_type<tc>, window_params = [{transform_indices = @transform_0, window_bounds = array<i64: 8, 8, 128>}, {transform_indices = @transform_1, window_bounds = array<i64: 1, 128, 512>}, {transform_indices = @transform_2, window_bounds = array<i64: 1, 128, 512>}, {transform_indices = @transform_3, window_bounds = array<i64: 1, 1, 512>}, {transform_indices = @transform_4, window_bounds = array<i64: 8, 8, 128>}, {transform_indices = @transform_5, window_bounds = array<i64: 1, 8, 128>}, {transform_indices = @transform_6, window_bounds = array<i64: 1, 8, 128>}]} {
    %c0_i32 = arith.constant 0 : i32
    %0 = arith.cmpi eq, %arg1, %c0_i32 : i32
    %1 = arith.extui %0 : i1 to i32
    %c0_i32_0 = arith.constant 0 : i32
    %2 = arith.cmpi ne, %1, %c0_i32_0 : i32
    scf.if %2 {
      %cst_164 = arith.constant 0.000000e+00 : f32
      %394 = vector.broadcast %cst_164 : f32 to vector<1x8x128xf32>
      %c0_165 = arith.constant 0 : index
      %c0_166 = arith.constant 0 : index
      %c0_167 = arith.constant 0 : index
      %395 = vector.load %arg7[%c0_165, %c0_166, %c0_167] : memref<1x8x128xf32, #tpu.memory_space<vmem>>, vector<1x8x128xf32>
      tpu.vector_store %arg7[%c0_165, %c0_166, %c0_167], %394 {strides = array<i32>} : memref<1x8x128xf32, #tpu.memory_space<vmem>>, vector<1x8x128xf32>,
      %cst_168 = arith.constant 0.000000e+00 : f32
      %396 = vector.broadcast %cst_168 : f32 to vector<1x8x128xf32>
      %c0_169 = arith.constant 0 : index
      %c0_170 = arith.constant 0 : index
      %c0_171 = arith.constant 0 : index
      %397 = vector.load %arg8[%c0_169, %c0_170, %c0_171] : memref<1x8x128xf32, #tpu.memory_space<vmem>>, vector<1x8x128xf32>
      tpu.vector_store %arg8[%c0_169, %c0_170, %c0_171], %396 {strides = array<i32>} : memref<1x8x128xf32, #tpu.memory_space<vmem>>, vector<1x8x128xf32>,
    } else {
    }
    %c0 = arith.constant 0 : index
    %c0_1 = arith.constant 0 : index
    %c0_2 = arith.constant 0 : index
    %3 = vector.load %arg3[%c0, %c0_1, %c0_2] : memref<1x128x512xbf16, #tpu.memory_space<vmem>>, vector<1x128x512xbf16>
    %4 = vector.shape_cast %3 : vector<1x128x512xbf16> to vector<128x512xbf16>
    %c0_3 = arith.constant 0 : index
    %c0_4 = arith.constant 0 : index
    %c0_5 = arith.constant 0 : index
    %5 = vector.load %arg4[%c0_3, %c0_4, %c0_5] : memref<1x128x512xbf16, #tpu.memory_space<vmem>>, vector<1x128x512xbf16>
    %6 = vector.shape_cast %5 : vector<1x128x512xbf16> to vector<128x512xbf16>
    %c0_6 = arith.constant 0 : index
    %c0_7 = arith.constant 0 : index
    %c0_8 = arith.constant 0 : index
    %7 = vector.load %arg5[%c0_6, %c0_7, %c0_8] : memref<1x1x512xf32, #tpu.memory_space<vmem>>, vector<1x1x512xf32>
    %8 = vector.shape_cast %7 : vector<1x1x512xf32> to vector<1x512xf32>
    %c0_9 = arith.constant 0 : index
    %c0_10 = arith.constant 0 : index
    %c0_11 = arith.constant 0 : index
    %9 = vector.load %arg2[%c0_9, %c0_10, %c0_11] : memref<8x8x128xbf16, #tpu.memory_space<vmem>>, vector<8x8x128xbf16>
    %10 = vector.shape_cast %9 : vector<8x8x128xbf16> to vector<64x128xbf16>
    %cst = arith.constant dense<0.000000e+00> : vector<64x512xf32>
    %11 = tpu.matmul %10, %4, %cst {dimension_numbers = #tpu.dot_dimension_numbers<[1], [0], [0], [1], [0, 0, 1, 1], [], []>} : vector<64x128xbf16>, vector<128x512xbf16>, vector<64x512xf32> -> vector<64x512xf32>
    %12 = vector.broadcast %8 : vector<1x512xf32> to vector<64x512xf32>
    %13 = arith.addf %11, %12 : vector<64x512xf32>
    %14 = vector.shape_cast %13 : vector<64x512xf32> to vector<8x8x512xf32>
    %c0_12 = arith.constant 0 : index
    %c0_13 = arith.constant 0 : index
    %c0_14 = arith.constant 0 : index
    %15 = vector.load %arg9[%c0_12, %c0_13, %c0_14] : memref<8x8x512xf32, #tpu.memory_space<vmem>>, vector<8x8x512xf32>
    tpu.vector_store %arg9[%c0_12, %c0_13, %c0_14], %14 {strides = array<i32>} : memref<8x8x512xf32, #tpu.memory_space<vmem>>, vector<8x8x512xf32>,
    %c0_15 = arith.constant 0 : index
    %c0_16 = arith.constant 0 : index
    %c0_17 = arith.constant 0 : index
    %16 = vector.load %arg7[%c0_15, %c0_16, %c0_17] : memref<1x8x128xf32, #tpu.memory_space<vmem>>, vector<1x8x128xf32>
    %17 = vector.shape_cast %16 : vector<1x8x128xf32> to vector<8x128xf32>
    %c0_18 = arith.constant 0 : index
    %c0_19 = arith.constant 0 : index
    %c0_20 = arith.constant 0 : index
    %18 = vector.load %arg8[%c0_18, %c0_19, %c0_20] : memref<1x8x128xf32, #tpu.memory_space<vmem>>, vector<1x8x128xf32>
    %19 = vector.shape_cast %18 : vector<1x8x128xf32> to vector<8x128xf32>
    %c0_i32_21 = arith.constant 0 : i32
    %c7_i32 = arith.constant 7 : i32
    %20 = arith.muli %arg0, %c7_i32 : i32
    %c2_i32 = arith.constant 2 : i32
    %21 = arith.muli %c2_i32, %arg0 : i32
    %c1_i32 = arith.constant 1 : i32
    %22 = arith.subi %c1_i32, %21 : i32
    %23 = arith.muli %22, %c0_i32_21 : i32
    %24 = arith.addi %20, %23 : i32
    %25 = arith.index_cast %24 : i32 to index
    %c0_22 = arith.constant 0 : index
    %c0_23 = arith.constant 0 : index
    %26 = vector.load %arg9[%25, %c0_22, %c0_23] : memref<8x8x512xf32, #tpu.memory_space<vmem>>, vector<1x8x512xf32>
    %27 = vector.shape_cast %26 : vector<1x8x512xf32> to vector<8x512xf32>
    %28 = arith.truncf %17 : vector<8x128xf32> to vector<8x128xbf16>
    %cst_24 = arith.constant dense<0.000000e+00> : vector<8x512xf32>
    %29 = tpu.matmul %28, %6, %cst_24 {dimension_numbers = #tpu.dot_dimension_numbers<[1], [0], [0], [1], [0, 0, 1, 1], [], []>} : vector<8x128xbf16>, vector<128x512xbf16>, vector<8x512xf32> -> vector<8x512xf32>
    %30 = arith.addf %27, %29 : vector<8x512xf32>
    %31 = vector.extract_strided_slice %30 {offsets = [0, 0], sizes = [8, 128], strides = [1, 1]} : vector<8x512xf32> to vector<8x128xf32>
    %cst_25 = arith.constant 5.000000e-01 : f32
    %32 = vector.broadcast %cst_25 : f32 to vector<8x128xf32>
    %33 = arith.mulf %32, %31 : vector<8x128xf32>
    %34 = math.tanh %33 : vector<8x128xf32>
    %cst_26 = arith.constant 5.000000e-01 : f32
    %35 = vector.broadcast %cst_26 : f32 to vector<8x128xf32>
    %36 = arith.mulf %35, %34 : vector<8x128xf32>
    %cst_27 = arith.constant 5.000000e-01 : f32
    %37 = vector.broadcast %cst_27 : f32 to vector<8x128xf32>
    %38 = arith.addf %36, %37 : vector<8x128xf32>
    %39 = vector.extract_strided_slice %30 {offsets = [0, 128], sizes = [8, 128], strides = [1, 1]} : vector<8x512xf32> to vector<8x128xf32>
    %cst_28 = arith.constant 5.000000e-01 : f32
    %40 = vector.broadcast %cst_28 : f32 to vector<8x128xf32>
    %41 = arith.mulf %40, %39 : vector<8x128xf32>
    %42 = math.tanh %41 : vector<8x128xf32>
    %cst_29 = arith.constant 5.000000e-01 : f32
    %43 = vector.broadcast %cst_29 : f32 to vector<8x128xf32>
    %44 = arith.mulf %43, %42 : vector<8x128xf32>
    %cst_30 = arith.constant 5.000000e-01 : f32
    %45 = vector.broadcast %cst_30 : f32 to vector<8x128xf32>
    %46 = arith.addf %44, %45 : vector<8x128xf32>
    %47 = vector.extract_strided_slice %30 {offsets = [0, 256], sizes = [8, 128], strides = [1, 1]} : vector<8x512xf32> to vector<8x128xf32>
    %48 = math.tanh %47 : vector<8x128xf32>
    %49 = vector.extract_strided_slice %30 {offsets = [0, 384], sizes = [8, 128], strides = [1, 1]} : vector<8x512xf32> to vector<8x128xf32>
    %cst_31 = arith.constant 5.000000e-01 : f32
    %50 = vector.broadcast %cst_31 : f32 to vector<8x128xf32>
    %51 = arith.mulf %50, %49 : vector<8x128xf32>
    %52 = math.tanh %51 : vector<8x128xf32>
    %cst_32 = arith.constant 5.000000e-01 : f32
    %53 = vector.broadcast %cst_32 : f32 to vector<8x128xf32>
    %54 = arith.mulf %53, %52 : vector<8x128xf32>
    %cst_33 = arith.constant 5.000000e-01 : f32
    %55 = vector.broadcast %cst_33 : f32 to vector<8x128xf32>
    %56 = arith.addf %54, %55 : vector<8x128xf32>
    %57 = arith.mulf %46, %19 : vector<8x128xf32>
    %58 = arith.mulf %38, %48 : vector<8x128xf32>
    %59 = arith.addf %57, %58 : vector<8x128xf32>
    %60 = math.tanh %59 : vector<8x128xf32>
    %61 = arith.mulf %56, %60 : vector<8x128xf32>
    %62 = arith.index_cast %24 : i32 to index
    %c0_34 = arith.constant 0 : index
    %c0_35 = arith.constant 0 : index
    %63 = vector.load %arg6[%62, %c0_34, %c0_35] : memref<8x8x128xf32, #tpu.memory_space<vmem>>, vector<1x8x128xf32>
    %64 = vector.shape_cast %63 : vector<1x8x128xf32> to vector<8x128xf32>
    %65 = vector.shape_cast %61 : vector<8x128xf32> to vector<1x8x128xf32>
    tpu.vector_store %arg6[%62, %c0_34, %c0_35], %65 {strides = array<i32>} : memref<8x8x128xf32, #tpu.memory_space<vmem>>, vector<1x8x128xf32>,
    %c1_i32_36 = arith.constant 1 : i32
    %c7_i32_37 = arith.constant 7 : i32
    %66 = arith.muli %arg0, %c7_i32_37 : i32
    %c2_i32_38 = arith.constant 2 : i32
    %67 = arith.muli %c2_i32_38, %arg0 : i32
    %c1_i32_39 = arith.constant 1 : i32
    %68 = arith.subi %c1_i32_39, %67 : i32
    %69 = arith.muli %68, %c1_i32_36 : i32
    %70 = arith.addi %66, %69 : i32
    %71 = arith.index_cast %70 : i32 to index
    %c0_40 = arith.constant 0 : index
    %c0_41 = arith.constant 0 : index
    %72 = vector.load %arg9[%71, %c0_40, %c0_41] : memref<8x8x512xf32, #tpu.memory_space<vmem>>, vector<1x8x512xf32>
    %73 = vector.shape_cast %72 : vector<1x8x512xf32> to vector<8x512xf32>
    %74 = arith.truncf %61 : vector<8x128xf32> to vector<8x128xbf16>
    %cst_42 = arith.constant dense<0.000000e+00> : vector<8x512xf32>
    %75 = tpu.matmul %74, %6, %cst_42 {dimension_numbers = #tpu.dot_dimension_numbers<[1], [0], [0], [1], [0, 0, 1, 1], [], []>} : vector<8x128xbf16>, vector<128x512xbf16>, vector<8x512xf32> -> vector<8x512xf32>
    %76 = arith.addf %73, %75 : vector<8x512xf32>
    %77 = vector.extract_strided_slice %76 {offsets = [0, 0], sizes = [8, 128], strides = [1, 1]} : vector<8x512xf32> to vector<8x128xf32>
    %cst_43 = arith.constant 5.000000e-01 : f32
    %78 = vector.broadcast %cst_43 : f32 to vector<8x128xf32>
    %79 = arith.mulf %78, %77 : vector<8x128xf32>
    %80 = math.tanh %79 : vector<8x128xf32>
    %cst_44 = arith.constant 5.000000e-01 : f32
    %81 = vector.broadcast %cst_44 : f32 to vector<8x128xf32>
    %82 = arith.mulf %81, %80 : vector<8x128xf32>
    %cst_45 = arith.constant 5.000000e-01 : f32
    %83 = vector.broadcast %cst_45 : f32 to vector<8x128xf32>
    %84 = arith.addf %82, %83 : vector<8x128xf32>
    %85 = vector.extract_strided_slice %76 {offsets = [0, 128], sizes = [8, 128], strides = [1, 1]} : vector<8x512xf32> to vector<8x128xf32>
    %cst_46 = arith.constant 5.000000e-01 : f32
    %86 = vector.broadcast %cst_46 : f32 to vector<8x128xf32>
    %87 = arith.mulf %86, %85 : vector<8x128xf32>
    %88 = math.tanh %87 : vector<8x128xf32>
    %cst_47 = arith.constant 5.000000e-01 : f32
    %89 = vector.broadcast %cst_47 : f32 to vector<8x128xf32>
    %90 = arith.mulf %89, %88 : vector<8x128xf32>
    %cst_48 = arith.constant 5.000000e-01 : f32
    %91 = vector.broadcast %cst_48 : f32 to vector<8x128xf32>
    %92 = arith.addf %90, %91 : vector<8x128xf32>
    %93 = vector.extract_strided_slice %76 {offsets = [0, 256], sizes = [8, 128], strides = [1, 1]} : vector<8x512xf32> to vector<8x128xf32>
    %94 = math.tanh %93 : vector<8x128xf32>
    %95 = vector.extract_strided_slice %76 {offsets = [0, 384], sizes = [8, 128], strides = [1, 1]} : vector<8x512xf32> to vector<8x128xf32>
    %cst_49 = arith.constant 5.000000e-01 : f32
    %96 = vector.broadcast %cst_49 : f32 to vector<8x128xf32>
    %97 = arith.mulf %96, %95 : vector<8x128xf32>
    %98 = math.tanh %97 : vector<8x128xf32>
    %cst_50 = arith.constant 5.000000e-01 : f32
    %99 = vector.broadcast %cst_50 : f32 to vector<8x128xf32>
    %100 = arith.mulf %99, %98 : vector<8x128xf32>
    %cst_51 = arith.constant 5.000000e-01 : f32
    %101 = vector.broadcast %cst_51 : f32 to vector<8x128xf32>
    %102 = arith.addf %100, %101 : vector<8x128xf32>
    %103 = arith.mulf %92, %59 : vector<8x128xf32>
    %104 = arith.mulf %84, %94 : vector<8x128xf32>
    %105 = arith.addf %103, %104 : vector<8x128xf32>
    %106 = math.tanh %105 : vector<8x128xf32>
    %107 = arith.mulf %102, %106 : vector<8x128xf32>
    %108 = arith.index_cast %70 : i32 to index
    %c0_52 = arith.constant 0 : index
    %c0_53 = arith.constant 0 : index
    %109 = vector.load %arg6[%108, %c0_52, %c0_53] : memref<8x8x128xf32, #tpu.memory_space<vmem>>, vector<1x8x128xf32>
    %110 = vector.shape_cast %109 : vector<1x8x128xf32> to vector<8x128xf32>
    %111 = vector.shape_cast %107 : vector<8x128xf32> to vector<1x8x128xf32>
    tpu.vector_store %arg6[%108, %c0_52, %c0_53], %111 {strides = array<i32>} : memref<8x8x128xf32, #tpu.memory_space<vmem>>, vector<1x8x128xf32>,
    %c2_i32_54 = arith.constant 2 : i32
    %c7_i32_55 = arith.constant 7 : i32
    %112 = arith.muli %arg0, %c7_i32_55 : i32
    %c2_i32_56 = arith.constant 2 : i32
    %113 = arith.muli %c2_i32_56, %arg0 : i32
    %c1_i32_57 = arith.constant 1 : i32
    %114 = arith.subi %c1_i32_57, %113 : i32
    %115 = arith.muli %114, %c2_i32_54 : i32
    %116 = arith.addi %112, %115 : i32
    %117 = arith.index_cast %116 : i32 to index
    %c0_58 = arith.constant 0 : index
    %c0_59 = arith.constant 0 : index
    %118 = vector.load %arg9[%117, %c0_58, %c0_59] : memref<8x8x512xf32, #tpu.memory_space<vmem>>, vector<1x8x512xf32>
    %119 = vector.shape_cast %118 : vector<1x8x512xf32> to vector<8x512xf32>
    %120 = arith.truncf %107 : vector<8x128xf32> to vector<8x128xbf16>
    %cst_60 = arith.constant dense<0.000000e+00> : vector<8x512xf32>
    %121 = tpu.matmul %120, %6, %cst_60 {dimension_numbers = #tpu.dot_dimension_numbers<[1], [0], [0], [1], [0, 0, 1, 1], [], []>} : vector<8x128xbf16>, vector<128x512xbf16>, vector<8x512xf32> -> vector<8x512xf32>
    %122 = arith.addf %119, %121 : vector<8x512xf32>
    %123 = vector.extract_strided_slice %122 {offsets = [0, 0], sizes = [8, 128], strides = [1, 1]} : vector<8x512xf32> to vector<8x128xf32>
    %cst_61 = arith.constant 5.000000e-01 : f32
    %124 = vector.broadcast %cst_61 : f32 to vector<8x128xf32>
    %125 = arith.mulf %124, %123 : vector<8x128xf32>
    %126 = math.tanh %125 : vector<8x128xf32>
    %cst_62 = arith.constant 5.000000e-01 : f32
    %127 = vector.broadcast %cst_62 : f32 to vector<8x128xf32>
    %128 = arith.mulf %127, %126 : vector<8x128xf32>
    %cst_63 = arith.constant 5.000000e-01 : f32
    %129 = vector.broadcast %cst_63 : f32 to vector<8x128xf32>
    %130 = arith.addf %128, %129 : vector<8x128xf32>
    %131 = vector.extract_strided_slice %122 {offsets = [0, 128], sizes = [8, 128], strides = [1, 1]} : vector<8x512xf32> to vector<8x128xf32>
    %cst_64 = arith.constant 5.000000e-01 : f32
    %132 = vector.broadcast %cst_64 : f32 to vector<8x128xf32>
    %133 = arith.mulf %132, %131 : vector<8x128xf32>
    %134 = math.tanh %133 : vector<8x128xf32>
    %cst_65 = arith.constant 5.000000e-01 : f32
    %135 = vector.broadcast %cst_65 : f32 to vector<8x128xf32>
    %136 = arith.mulf %135, %134 : vector<8x128xf32>
    %cst_66 = arith.constant 5.000000e-01 : f32
    %137 = vector.broadcast %cst_66 : f32 to vector<8x128xf32>
    %138 = arith.addf %136, %137 : vector<8x128xf32>
    %139 = vector.extract_strided_slice %122 {offsets = [0, 256], sizes = [8, 128], strides = [1, 1]} : vector<8x512xf32> to vector<8x128xf32>
    %140 = math.tanh %139 : vector<8x128xf32>
    %141 = vector.extract_strided_slice %122 {offsets = [0, 384], sizes = [8, 128], strides = [1, 1]} : vector<8x512xf32> to vector<8x128xf32>
    %cst_67 = arith.constant 5.000000e-01 : f32
    %142 = vector.broadcast %cst_67 : f32 to vector<8x128xf32>
    %143 = arith.mulf %142, %141 : vector<8x128xf32>
    %144 = math.tanh %143 : vector<8x128xf32>
    %cst_68 = arith.constant 5.000000e-01 : f32
    %145 = vector.broadcast %cst_68 : f32 to vector<8x128xf32>
    %146 = arith.mulf %145, %144 : vector<8x128xf32>
    %cst_69 = arith.constant 5.000000e-01 : f32
    %147 = vector.broadcast %cst_69 : f32 to vector<8x128xf32>
    %148 = arith.addf %146, %147 : vector<8x128xf32>
    %149 = arith.mulf %138, %105 : vector<8x128xf32>
    %150 = arith.mulf %130, %140 : vector<8x128xf32>
    %151 = arith.addf %149, %150 : vector<8x128xf32>
    %152 = math.tanh %151 : vector<8x128xf32>
    %153 = arith.mulf %148, %152 : vector<8x128xf32>
    %154 = arith.index_cast %116 : i32 to index
    %c0_70 = arith.constant 0 : index
    %c0_71 = arith.constant 0 : index
    %155 = vector.load %arg6[%154, %c0_70, %c0_71] : memref<8x8x128xf32, #tpu.memory_space<vmem>>, vector<1x8x128xf32>
    %156 = vector.shape_cast %155 : vector<1x8x128xf32> to vector<8x128xf32>
    %157 = vector.shape_cast %153 : vector<8x128xf32> to vector<1x8x128xf32>
    tpu.vector_store %arg6[%154, %c0_70, %c0_71], %157 {strides = array<i32>} : memref<8x8x128xf32, #tpu.memory_space<vmem>>, vector<1x8x128xf32>,
    %c3_i32 = arith.constant 3 : i32
    %c7_i32_72 = arith.constant 7 : i32
    %158 = arith.muli %arg0, %c7_i32_72 : i32
    %c2_i32_73 = arith.constant 2 : i32
    %159 = arith.muli %c2_i32_73, %arg0 : i32
    %c1_i32_74 = arith.constant 1 : i32
    %160 = arith.subi %c1_i32_74, %159 : i32
    %161 = arith.muli %160, %c3_i32 : i32
    %162 = arith.addi %158, %161 : i32
    %163 = arith.index_cast %162 : i32 to index
    %c0_75 = arith.constant 0 : index
    %c0_76 = arith.constant 0 : index
    %164 = vector.load %arg9[%163, %c0_75, %c0_76] : memref<8x8x512xf32, #tpu.memory_space<vmem>>, vector<1x8x512xf32>
    %165 = vector.shape_cast %164 : vector<1x8x512xf32> to vector<8x512xf32>
    %166 = arith.truncf %153 : vector<8x128xf32> to vector<8x128xbf16>
    %cst_77 = arith.constant dense<0.000000e+00> : vector<8x512xf32>
    %167 = tpu.matmul %166, %6, %cst_77 {dimension_numbers = #tpu.dot_dimension_numbers<[1], [0], [0], [1], [0, 0, 1, 1], [], []>} : vector<8x128xbf16>, vector<128x512xbf16>, vector<8x512xf32> -> vector<8x512xf32>
    %168 = arith.addf %165, %167 : vector<8x512xf32>
    %169 = vector.extract_strided_slice %168 {offsets = [0, 0], sizes = [8, 128], strides = [1, 1]} : vector<8x512xf32> to vector<8x128xf32>
    %cst_78 = arith.constant 5.000000e-01 : f32
    %170 = vector.broadcast %cst_78 : f32 to vector<8x128xf32>
    %171 = arith.mulf %170, %169 : vector<8x128xf32>
    %172 = math.tanh %171 : vector<8x128xf32>
    %cst_79 = arith.constant 5.000000e-01 : f32
    %173 = vector.broadcast %cst_79 : f32 to vector<8x128xf32>
    %174 = arith.mulf %173, %172 : vector<8x128xf32>
    %cst_80 = arith.constant 5.000000e-01 : f32
    %175 = vector.broadcast %cst_80 : f32 to vector<8x128xf32>
    %176 = arith.addf %174, %175 : vector<8x128xf32>
    %177 = vector.extract_strided_slice %168 {offsets = [0, 128], sizes = [8, 128], strides = [1, 1]} : vector<8x512xf32> to vector<8x128xf32>
    %cst_81 = arith.constant 5.000000e-01 : f32
    %178 = vector.broadcast %cst_81 : f32 to vector<8x128xf32>
    %179 = arith.mulf %178, %177 : vector<8x128xf32>
    %180 = math.tanh %179 : vector<8x128xf32>
    %cst_82 = arith.constant 5.000000e-01 : f32
    %181 = vector.broadcast %cst_82 : f32 to vector<8x128xf32>
    %182 = arith.mulf %181, %180 : vector<8x128xf32>
    %cst_83 = arith.constant 5.000000e-01 : f32
    %183 = vector.broadcast %cst_83 : f32 to vector<8x128xf32>
    %184 = arith.addf %182, %183 : vector<8x128xf32>
    %185 = vector.extract_strided_slice %168 {offsets = [0, 256], sizes = [8, 128], strides = [1, 1]} : vector<8x512xf32> to vector<8x128xf32>
    %186 = math.tanh %185 : vector<8x128xf32>
    %187 = vector.extract_strided_slice %168 {offsets = [0, 384], sizes = [8, 128], strides = [1, 1]} : vector<8x512xf32> to vector<8x128xf32>
    %cst_84 = arith.constant 5.000000e-01 : f32
    %188 = vector.broadcast %cst_84 : f32 to vector<8x128xf32>
    %189 = arith.mulf %188, %187 : vector<8x128xf32>
    %190 = math.tanh %189 : vector<8x128xf32>
    %cst_85 = arith.constant 5.000000e-01 : f32
    %191 = vector.broadcast %cst_85 : f32 to vector<8x128xf32>
    %192 = arith.mulf %191, %190 : vector<8x128xf32>
    %cst_86 = arith.constant 5.000000e-01 : f32
    %193 = vector.broadcast %cst_86 : f32 to vector<8x128xf32>
    %194 = arith.addf %192, %193 : vector<8x128xf32>
    %195 = arith.mulf %184, %151 : vector<8x128xf32>
    %196 = arith.mulf %176, %186 : vector<8x128xf32>
    %197 = arith.addf %195, %196 : vector<8x128xf32>
    %198 = math.tanh %197 : vector<8x128xf32>
    %199 = arith.mulf %194, %198 : vector<8x128xf32>
    %200 = arith.index_cast %162 : i32 to index
    %c0_87 = arith.constant 0 : index
    %c0_88 = arith.constant 0 : index
    %201 = vector.load %arg6[%200, %c0_87, %c0_88] : memref<8x8x128xf32, #tpu.memory_space<vmem>>, vector<1x8x128xf32>
    %202 = vector.shape_cast %201 : vector<1x8x128xf32> to vector<8x128xf32>
    %203 = vector.shape_cast %199 : vector<8x128xf32> to vector<1x8x128xf32>
    tpu.vector_store %arg6[%200, %c0_87, %c0_88], %203 {strides = array<i32>} : memref<8x8x128xf32, #tpu.memory_space<vmem>>, vector<1x8x128xf32>,
    %c4_i32 = arith.constant 4 : i32
    %c7_i32_89 = arith.constant 7 : i32
    %204 = arith.muli %arg0, %c7_i32_89 : i32
    %c2_i32_90 = arith.constant 2 : i32
    %205 = arith.muli %c2_i32_90, %arg0 : i32
    %c1_i32_91 = arith.constant 1 : i32
    %206 = arith.subi %c1_i32_91, %205 : i32
    %207 = arith.muli %206, %c4_i32 : i32
    %208 = arith.addi %204, %207 : i32
    %209 = arith.index_cast %208 : i32 to index
    %c0_92 = arith.constant 0 : index
    %c0_93 = arith.constant 0 : index
    %210 = vector.load %arg9[%209, %c0_92, %c0_93] : memref<8x8x512xf32, #tpu.memory_space<vmem>>, vector<1x8x512xf32>
    %211 = vector.shape_cast %210 : vector<1x8x512xf32> to vector<8x512xf32>
    %212 = arith.truncf %199 : vector<8x128xf32> to vector<8x128xbf16>
    %cst_94 = arith.constant dense<0.000000e+00> : vector<8x512xf32>
    %213 = tpu.matmul %212, %6, %cst_94 {dimension_numbers = #tpu.dot_dimension_numbers<[1], [0], [0], [1], [0, 0, 1, 1], [], []>} : vector<8x128xbf16>, vector<128x512xbf16>, vector<8x512xf32> -> vector<8x512xf32>
    %214 = arith.addf %211, %213 : vector<8x512xf32>
    %215 = vector.extract_strided_slice %214 {offsets = [0, 0], sizes = [8, 128], strides = [1, 1]} : vector<8x512xf32> to vector<8x128xf32>
    %cst_95 = arith.constant 5.000000e-01 : f32
    %216 = vector.broadcast %cst_95 : f32 to vector<8x128xf32>
    %217 = arith.mulf %216, %215 : vector<8x128xf32>
    %218 = math.tanh %217 : vector<8x128xf32>
    %cst_96 = arith.constant 5.000000e-01 : f32
    %219 = vector.broadcast %cst_96 : f32 to vector<8x128xf32>
    %220 = arith.mulf %219, %218 : vector<8x128xf32>
    %cst_97 = arith.constant 5.000000e-01 : f32
    %221 = vector.broadcast %cst_97 : f32 to vector<8x128xf32>
    %222 = arith.addf %220, %221 : vector<8x128xf32>
    %223 = vector.extract_strided_slice %214 {offsets = [0, 128], sizes = [8, 128], strides = [1, 1]} : vector<8x512xf32> to vector<8x128xf32>
    %cst_98 = arith.constant 5.000000e-01 : f32
    %224 = vector.broadcast %cst_98 : f32 to vector<8x128xf32>
    %225 = arith.mulf %224, %223 : vector<8x128xf32>
    %226 = math.tanh %225 : vector<8x128xf32>
    %cst_99 = arith.constant 5.000000e-01 : f32
    %227 = vector.broadcast %cst_99 : f32 to vector<8x128xf32>
    %228 = arith.mulf %227, %226 : vector<8x128xf32>
    %cst_100 = arith.constant 5.000000e-01 : f32
    %229 = vector.broadcast %cst_100 : f32 to vector<8x128xf32>
    %230 = arith.addf %228, %229 : vector<8x128xf32>
    %231 = vector.extract_strided_slice %214 {offsets = [0, 256], sizes = [8, 128], strides = [1, 1]} : vector<8x512xf32> to vector<8x128xf32>
    %232 = math.tanh %231 : vector<8x128xf32>
    %233 = vector.extract_strided_slice %214 {offsets = [0, 384], sizes = [8, 128], strides = [1, 1]} : vector<8x512xf32> to vector<8x128xf32>
    %cst_101 = arith.constant 5.000000e-01 : f32
    %234 = vector.broadcast %cst_101 : f32 to vector<8x128xf32>
    %235 = arith.mulf %234, %233 : vector<8x128xf32>
    %236 = math.tanh %235 : vector<8x128xf32>
    %cst_102 = arith.constant 5.000000e-01 : f32
    %237 = vector.broadcast %cst_102 : f32 to vector<8x128xf32>
    %238 = arith.mulf %237, %236 : vector<8x128xf32>
    %cst_103 = arith.constant 5.000000e-01 : f32
    %239 = vector.broadcast %cst_103 : f32 to vector<8x128xf32>
    %240 = arith.addf %238, %239 : vector<8x128xf32>
    %241 = arith.mulf %230, %197 : vector<8x128xf32>
    %242 = arith.mulf %222, %232 : vector<8x128xf32>
    %243 = arith.addf %241, %242 : vector<8x128xf32>
    %244 = math.tanh %243 : vector<8x128xf32>
    %245 = arith.mulf %240, %244 : vector<8x128xf32>
    %246 = arith.index_cast %208 : i32 to index
    %c0_104 = arith.constant 0 : index
    %c0_105 = arith.constant 0 : index
    %247 = vector.load %arg6[%246, %c0_104, %c0_105] : memref<8x8x128xf32, #tpu.memory_space<vmem>>, vector<1x8x128xf32>
    %248 = vector.shape_cast %247 : vector<1x8x128xf32> to vector<8x128xf32>
    %249 = vector.shape_cast %245 : vector<8x128xf32> to vector<1x8x128xf32>
    tpu.vector_store %arg6[%246, %c0_104, %c0_105], %249 {strides = array<i32>} : memref<8x8x128xf32, #tpu.memory_space<vmem>>, vector<1x8x128xf32>,
    %c5_i32 = arith.constant 5 : i32
    %c7_i32_106 = arith.constant 7 : i32
    %250 = arith.muli %arg0, %c7_i32_106 : i32
    %c2_i32_107 = arith.constant 2 : i32
    %251 = arith.muli %c2_i32_107, %arg0 : i32
    %c1_i32_108 = arith.constant 1 : i32
    %252 = arith.subi %c1_i32_108, %251 : i32
    %253 = arith.muli %252, %c5_i32 : i32
    %254 = arith.addi %250, %253 : i32
    %255 = arith.index_cast %254 : i32 to index
    %c0_109 = arith.constant 0 : index
    %c0_110 = arith.constant 0 : index
    %256 = vector.load %arg9[%255, %c0_109, %c0_110] : memref<8x8x512xf32, #tpu.memory_space<vmem>>, vector<1x8x512xf32>
    %257 = vector.shape_cast %256 : vector<1x8x512xf32> to vector<8x512xf32>
    %258 = arith.truncf %245 : vector<8x128xf32> to vector<8x128xbf16>
    %cst_111 = arith.constant dense<0.000000e+00> : vector<8x512xf32>
    %259 = tpu.matmul %258, %6, %cst_111 {dimension_numbers = #tpu.dot_dimension_numbers<[1], [0], [0], [1], [0, 0, 1, 1], [], []>} : vector<8x128xbf16>, vector<128x512xbf16>, vector<8x512xf32> -> vector<8x512xf32>
    %260 = arith.addf %257, %259 : vector<8x512xf32>
    %261 = vector.extract_strided_slice %260 {offsets = [0, 0], sizes = [8, 128], strides = [1, 1]} : vector<8x512xf32> to vector<8x128xf32>
    %cst_112 = arith.constant 5.000000e-01 : f32
    %262 = vector.broadcast %cst_112 : f32 to vector<8x128xf32>
    %263 = arith.mulf %262, %261 : vector<8x128xf32>
    %264 = math.tanh %263 : vector<8x128xf32>
    %cst_113 = arith.constant 5.000000e-01 : f32
    %265 = vector.broadcast %cst_113 : f32 to vector<8x128xf32>
    %266 = arith.mulf %265, %264 : vector<8x128xf32>
    %cst_114 = arith.constant 5.000000e-01 : f32
    %267 = vector.broadcast %cst_114 : f32 to vector<8x128xf32>
    %268 = arith.addf %266, %267 : vector<8x128xf32>
    %269 = vector.extract_strided_slice %260 {offsets = [0, 128], sizes = [8, 128], strides = [1, 1]} : vector<8x512xf32> to vector<8x128xf32>
    %cst_115 = arith.constant 5.000000e-01 : f32
    %270 = vector.broadcast %cst_115 : f32 to vector<8x128xf32>
    %271 = arith.mulf %270, %269 : vector<8x128xf32>
    %272 = math.tanh %271 : vector<8x128xf32>
    %cst_116 = arith.constant 5.000000e-01 : f32
    %273 = vector.broadcast %cst_116 : f32 to vector<8x128xf32>
    %274 = arith.mulf %273, %272 : vector<8x128xf32>
    %cst_117 = arith.constant 5.000000e-01 : f32
    %275 = vector.broadcast %cst_117 : f32 to vector<8x128xf32>
    %276 = arith.addf %274, %275 : vector<8x128xf32>
    %277 = vector.extract_strided_slice %260 {offsets = [0, 256], sizes = [8, 128], strides = [1, 1]} : vector<8x512xf32> to vector<8x128xf32>
    %278 = math.tanh %277 : vector<8x128xf32>
    %279 = vector.extract_strided_slice %260 {offsets = [0, 384], sizes = [8, 128], strides = [1, 1]} : vector<8x512xf32> to vector<8x128xf32>
    %cst_118 = arith.constant 5.000000e-01 : f32
    %280 = vector.broadcast %cst_118 : f32 to vector<8x128xf32>
    %281 = arith.mulf %280, %279 : vector<8x128xf32>
    %282 = math.tanh %281 : vector<8x128xf32>
    %cst_119 = arith.constant 5.000000e-01 : f32
    %283 = vector.broadcast %cst_119 : f32 to vector<8x128xf32>
    %284 = arith.mulf %283, %282 : vector<8x128xf32>
    %cst_120 = arith.constant 5.000000e-01 : f32
    %285 = vector.broadcast %cst_120 : f32 to vector<8x128xf32>
    %286 = arith.addf %284, %285 : vector<8x128xf32>
    %287 = arith.mulf %276, %243 : vector<8x128xf32>
    %288 = arith.mulf %268, %278 : vector<8x128xf32>
    %289 = arith.addf %287, %288 : vector<8x128xf32>
    %290 = math.tanh %289 : vector<8x128xf32>
    %291 = arith.mulf %286, %290 : vector<8x128xf32>
    %292 = arith.index_cast %254 : i32 to index
    %c0_121 = arith.constant 0 : index
    %c0_122 = arith.constant 0 : index
    %293 = vector.load %arg6[%292, %c0_121, %c0_122] : memref<8x8x128xf32, #tpu.memory_space<vmem>>, vector<1x8x128xf32>
    %294 = vector.shape_cast %293 : vector<1x8x128xf32> to vector<8x128xf32>
    %295 = vector.shape_cast %291 : vector<8x128xf32> to vector<1x8x128xf32>
    tpu.vector_store %arg6[%292, %c0_121, %c0_122], %295 {strides = array<i32>} : memref<8x8x128xf32, #tpu.memory_space<vmem>>, vector<1x8x128xf32>,
    %c6_i32 = arith.constant 6 : i32
    %c7_i32_123 = arith.constant 7 : i32
    %296 = arith.muli %arg0, %c7_i32_123 : i32
    %c2_i32_124 = arith.constant 2 : i32
    %297 = arith.muli %c2_i32_124, %arg0 : i32
    %c1_i32_125 = arith.constant 1 : i32
    %298 = arith.subi %c1_i32_125, %297 : i32
    %299 = arith.muli %298, %c6_i32 : i32
    %300 = arith.addi %296, %299 : i32
    %301 = arith.index_cast %300 : i32 to index
    %c0_126 = arith.constant 0 : index
    %c0_127 = arith.constant 0 : index
    %302 = vector.load %arg9[%301, %c0_126, %c0_127] : memref<8x8x512xf32, #tpu.memory_space<vmem>>, vector<1x8x512xf32>
    %303 = vector.shape_cast %302 : vector<1x8x512xf32> to vector<8x512xf32>
    %304 = arith.truncf %291 : vector<8x128xf32> to vector<8x128xbf16>
    %cst_128 = arith.constant dense<0.000000e+00> : vector<8x512xf32>
    %305 = tpu.matmul %304, %6, %cst_128 {dimension_numbers = #tpu.dot_dimension_numbers<[1], [0], [0], [1], [0, 0, 1, 1], [], []>} : vector<8x128xbf16>, vector<128x512xbf16>, vector<8x512xf32> -> vector<8x512xf32>
    %306 = arith.addf %303, %305 : vector<8x512xf32>
    %307 = vector.extract_strided_slice %306 {offsets = [0, 0], sizes = [8, 128], strides = [1, 1]} : vector<8x512xf32> to vector<8x128xf32>
    %cst_129 = arith.constant 5.000000e-01 : f32
    %308 = vector.broadcast %cst_129 : f32 to vector<8x128xf32>
    %309 = arith.mulf %308, %307 : vector<8x128xf32>
    %310 = math.tanh %309 : vector<8x128xf32>
    %cst_130 = arith.constant 5.000000e-01 : f32
    %311 = vector.broadcast %cst_130 : f32 to vector<8x128xf32>
    %312 = arith.mulf %311, %310 : vector<8x128xf32>
    %cst_131 = arith.constant 5.000000e-01 : f32
    %313 = vector.broadcast %cst_131 : f32 to vector<8x128xf32>
    %314 = arith.addf %312, %313 : vector<8x128xf32>
    %315 = vector.extract_strided_slice %306 {offsets = [0, 128], sizes = [8, 128], strides = [1, 1]} : vector<8x512xf32> to vector<8x128xf32>
    %cst_132 = arith.constant 5.000000e-01 : f32
    %316 = vector.broadcast %cst_132 : f32 to vector<8x128xf32>
    %317 = arith.mulf %316, %315 : vector<8x128xf32>
    %318 = math.tanh %317 : vector<8x128xf32>
    %cst_133 = arith.constant 5.000000e-01 : f32
    %319 = vector.broadcast %cst_133 : f32 to vector<8x128xf32>
    %320 = arith.mulf %319, %318 : vector<8x128xf32>
    %cst_134 = arith.constant 5.000000e-01 : f32
    %321 = vector.broadcast %cst_134 : f32 to vector<8x128xf32>
    %322 = arith.addf %320, %321 : vector<8x128xf32>
    %323 = vector.extract_strided_slice %306 {offsets = [0, 256], sizes = [8, 128], strides = [1, 1]} : vector<8x512xf32> to vector<8x128xf32>
    %324 = math.tanh %323 : vector<8x128xf32>
    %325 = vector.extract_strided_slice %306 {offsets = [0, 384], sizes = [8, 128], strides = [1, 1]} : vector<8x512xf32> to vector<8x128xf32>
    %cst_135 = arith.constant 5.000000e-01 : f32
    %326 = vector.broadcast %cst_135 : f32 to vector<8x128xf32>
    %327 = arith.mulf %326, %325 : vector<8x128xf32>
    %328 = math.tanh %327 : vector<8x128xf32>
    %cst_136 = arith.constant 5.000000e-01 : f32
    %329 = vector.broadcast %cst_136 : f32 to vector<8x128xf32>
    %330 = arith.mulf %329, %328 : vector<8x128xf32>
    %cst_137 = arith.constant 5.000000e-01 : f32
    %331 = vector.broadcast %cst_137 : f32 to vector<8x128xf32>
    %332 = arith.addf %330, %331 : vector<8x128xf32>
    %333 = arith.mulf %322, %289 : vector<8x128xf32>
    %334 = arith.mulf %314, %324 : vector<8x128xf32>
    %335 = arith.addf %333, %334 : vector<8x128xf32>
    %336 = math.tanh %335 : vector<8x128xf32>
    %337 = arith.mulf %332, %336 : vector<8x128xf32>
    %338 = arith.index_cast %300 : i32 to index
    %c0_138 = arith.constant 0 : index
    %c0_139 = arith.constant 0 : index
    %339 = vector.load %arg6[%338, %c0_138, %c0_139] : memref<8x8x128xf32, #tpu.memory_space<vmem>>, vector<1x8x128xf32>
    %340 = vector.shape_cast %339 : vector<1x8x128xf32> to vector<8x128xf32>
    %341 = vector.shape_cast %337 : vector<8x128xf32> to vector<1x8x128xf32>
    tpu.vector_store %arg6[%338, %c0_138, %c0_139], %341 {strides = array<i32>} : memref<8x8x128xf32, #tpu.memory_space<vmem>>, vector<1x8x128xf32>,
    %c7_i32_140 = arith.constant 7 : i32
    %c7_i32_141 = arith.constant 7 : i32
    %342 = arith.muli %arg0, %c7_i32_141 : i32
    %c2_i32_142 = arith.constant 2 : i32
    %343 = arith.muli %c2_i32_142, %arg0 : i32
    %c1_i32_143 = arith.constant 1 : i32
    %344 = arith.subi %c1_i32_143, %343 : i32
    %345 = arith.muli %344, %c7_i32_140 : i32
    %346 = arith.addi %342, %345 : i32
    %347 = arith.index_cast %346 : i32 to index
    %c0_144 = arith.constant 0 : index
    %c0_145 = arith.constant 0 : index
    %348 = vector.load %arg9[%347, %c0_144, %c0_145] : memref<8x8x512xf32, #tpu.memory_space<vmem>>, vector<1x8x512xf32>
    %349 = vector.shape_cast %348 : vector<1x8x512xf32> to vector<8x512xf32>
    %350 = arith.truncf %337 : vector<8x128xf32> to vector<8x128xbf16>
    %cst_146 = arith.constant dense<0.000000e+00> : vector<8x512xf32>
    %351 = tpu.matmul %350, %6, %cst_146 {dimension_numbers = #tpu.dot_dimension_numbers<[1], [0], [0], [1], [0, 0, 1, 1], [], []>} : vector<8x128xbf16>, vector<128x512xbf16>, vector<8x512xf32> -> vector<8x512xf32>
    %352 = arith.addf %349, %351 : vector<8x512xf32>
    %353 = vector.extract_strided_slice %352 {offsets = [0, 0], sizes = [8, 128], strides = [1, 1]} : vector<8x512xf32> to vector<8x128xf32>
    %cst_147 = arith.constant 5.000000e-01 : f32
    %354 = vector.broadcast %cst_147 : f32 to vector<8x128xf32>
    %355 = arith.mulf %354, %353 : vector<8x128xf32>
    %356 = math.tanh %355 : vector<8x128xf32>
    %cst_148 = arith.constant 5.000000e-01 : f32
    %357 = vector.broadcast %cst_148 : f32 to vector<8x128xf32>
    %358 = arith.mulf %357, %356 : vector<8x128xf32>
    %cst_149 = arith.constant 5.000000e-01 : f32
    %359 = vector.broadcast %cst_149 : f32 to vector<8x128xf32>
    %360 = arith.addf %358, %359 : vector<8x128xf32>
    %361 = vector.extract_strided_slice %352 {offsets = [0, 128], sizes = [8, 128], strides = [1, 1]} : vector<8x512xf32> to vector<8x128xf32>
    %cst_150 = arith.constant 5.000000e-01 : f32
    %362 = vector.broadcast %cst_150 : f32 to vector<8x128xf32>
    %363 = arith.mulf %362, %361 : vector<8x128xf32>
    %364 = math.tanh %363 : vector<8x128xf32>
    %cst_151 = arith.constant 5.000000e-01 : f32
    %365 = vector.broadcast %cst_151 : f32 to vector<8x128xf32>
    %366 = arith.mulf %365, %364 : vector<8x128xf32>
    %cst_152 = arith.constant 5.000000e-01 : f32
    %367 = vector.broadcast %cst_152 : f32 to vector<8x128xf32>
    %368 = arith.addf %366, %367 : vector<8x128xf32>
    %369 = vector.extract_strided_slice %352 {offsets = [0, 256], sizes = [8, 128], strides = [1, 1]} : vector<8x512xf32> to vector<8x128xf32>
    %370 = math.tanh %369 : vector<8x128xf32>
    %371 = vector.extract_strided_slice %352 {offsets = [0, 384], sizes = [8, 128], strides = [1, 1]} : vector<8x512xf32> to vector<8x128xf32>
    %cst_153 = arith.constant 5.000000e-01 : f32
    %372 = vector.broadcast %cst_153 : f32 to vector<8x128xf32>
    %373 = arith.mulf %372, %371 : vector<8x128xf32>
    %374 = math.tanh %373 : vector<8x128xf32>
    %cst_154 = arith.constant 5.000000e-01 : f32
    %375 = vector.broadcast %cst_154 : f32 to vector<8x128xf32>
    %376 = arith.mulf %375, %374 : vector<8x128xf32>
    %cst_155 = arith.constant 5.000000e-01 : f32
    %377 = vector.broadcast %cst_155 : f32 to vector<8x128xf32>
    %378 = arith.addf %376, %377 : vector<8x128xf32>
    %379 = arith.mulf %368, %335 : vector<8x128xf32>
    %380 = arith.mulf %360, %370 : vector<8x128xf32>
    %381 = arith.addf %379, %380 : vector<8x128xf32>
    %382 = math.tanh %381 : vector<8x128xf32>
    %383 = arith.mulf %378, %382 : vector<8x128xf32>
    %384 = arith.index_cast %346 : i32 to index
    %c0_156 = arith.constant 0 : index
    %c0_157 = arith.constant 0 : index
    %385 = vector.load %arg6[%384, %c0_156, %c0_157] : memref<8x8x128xf32, #tpu.memory_space<vmem>>, vector<1x8x128xf32>
    %386 = vector.shape_cast %385 : vector<1x8x128xf32> to vector<8x128xf32>
    %387 = vector.shape_cast %383 : vector<8x128xf32> to vector<1x8x128xf32>
    tpu.vector_store %arg6[%384, %c0_156, %c0_157], %387 {strides = array<i32>} : memref<8x8x128xf32, #tpu.memory_space<vmem>>, vector<1x8x128xf32>,
    %c8_i32 = arith.constant 8 : i32
    %c0_158 = arith.constant 0 : index
    %c0_159 = arith.constant 0 : index
    %c0_160 = arith.constant 0 : index
    %388 = vector.load %arg7[%c0_158, %c0_159, %c0_160] : memref<1x8x128xf32, #tpu.memory_space<vmem>>, vector<1x8x128xf32>
    %389 = vector.shape_cast %388 : vector<1x8x128xf32> to vector<8x128xf32>
    %390 = vector.shape_cast %383 : vector<8x128xf32> to vector<1x8x128xf32>
    tpu.vector_store %arg7[%c0_158, %c0_159, %c0_160], %390 {strides = array<i32>} : memref<1x8x128xf32, #tpu.memory_space<vmem>>, vector<1x8x128xf32>,
    %c0_161 = arith.constant 0 : index
    %c0_162 = arith.constant 0 : index
    %c0_163 = arith.constant 0 : index
    %391 = vector.load %arg8[%c0_161, %c0_162, %c0_163] : memref<1x8x128xf32, #tpu.memory_space<vmem>>, vector<1x8x128xf32>
    %392 = vector.shape_cast %391 : vector<1x8x128xf32> to vector<8x128xf32>
    %393 = vector.shape_cast %381 : vector<8x128xf32> to vector<1x8x128xf32>
    tpu.vector_store %arg8[%c0_161, %c0_162, %c0_163], %393 {strides = array<i32>} : memref<1x8x128xf32, #tpu.memory_space<vmem>>, vector<1x8x128xf32>,
    return
  }
  func.func @transform_0(%arg0: i32, %arg1: i32) -> (i32, i32, i32) {
    %c0_i32 = arith.constant 0 : i32
    %0 = arith.muli %arg0, %c0_i32 : i32
    %c2_i32 = arith.constant 2 : i32
    %1 = arith.muli %c2_i32, %arg0 : i32
    %c1_i32 = arith.constant 1 : i32
    %2 = arith.subi %c1_i32, %1 : i32
    %3 = arith.muli %2, %arg1 : i32
    %4 = arith.addi %0, %3 : i32
    %c0_i32_0 = arith.constant 0 : i32
    %c0_i32_1 = arith.constant 0 : i32
    %c0_i32_2 = arith.constant 0 : i32
    return %4, %c0_i32_0, %c0_i32_1 : i32, i32, i32
  }
  func.func @transform_1(%arg0: i32, %arg1: i32) -> (i32, i32, i32) {
    %c0_i32 = arith.constant 0 : i32
    %c0_i32_0 = arith.constant 0 : i32
    %c0_i32_1 = arith.constant 0 : i32
    return %arg0, %c0_i32, %c0_i32_0 : i32, i32, i32
  }
  func.func @transform_2(%arg0: i32, %arg1: i32) -> (i32, i32, i32) {
    %c0_i32 = arith.constant 0 : i32
    %c0_i32_0 = arith.constant 0 : i32
    %c0_i32_1 = arith.constant 0 : i32
    return %arg0, %c0_i32, %c0_i32_0 : i32, i32, i32
  }
  func.func @transform_3(%arg0: i32, %arg1: i32) -> (i32, i32, i32) {
    %c0_i32 = arith.constant 0 : i32
    %c0_i32_0 = arith.constant 0 : i32
    %c0_i32_1 = arith.constant 0 : i32
    return %arg0, %c0_i32, %c0_i32_0 : i32, i32, i32
  }
  func.func @transform_4(%arg0: i32, %arg1: i32) -> (i32, i32, i32) {
    %c0_i32 = arith.constant 0 : i32
    %0 = arith.muli %arg0, %c0_i32 : i32
    %c2_i32 = arith.constant 2 : i32
    %1 = arith.muli %c2_i32, %arg0 : i32
    %c1_i32 = arith.constant 1 : i32
    %2 = arith.subi %c1_i32, %1 : i32
    %3 = arith.muli %2, %arg1 : i32
    %4 = arith.addi %0, %3 : i32
    %c0_i32_0 = arith.constant 0 : i32
    %c0_i32_1 = arith.constant 0 : i32
    return %4, %c0_i32_0, %arg0 : i32, i32, i32
  }
  func.func @transform_5(%arg0: i32, %arg1: i32) -> (i32, i32, i32) {
    %c0_i32 = arith.constant 0 : i32
    %c0_i32_0 = arith.constant 0 : i32
    %c0_i32_1 = arith.constant 0 : i32
    return %arg0, %c0_i32, %c0_i32_0 : i32, i32, i32
  }
  func.func @transform_6(%arg0: i32, %arg1: i32) -> (i32, i32, i32) {
    %c0_i32 = arith.constant 0 : i32
    %c0_i32_0 = arith.constant 0 : i32
    %c0_i32_1 = arith.constant 0 : i32
    return %arg0, %c0_i32, %c0_i32_0 : i32, i32, i32
  }
}

</mosaic_0001>

<bundles_post_ra>
// kernel: tpu_custom_call.1
= control target key start
LH: loop header
LB: loop body
LE: loop exit
PB: predicated region body
PF: predicated region fallthrough
CT: control target
= control target key end

     0   :  { %s4015_s0 = inlined_call_operand.hbm [shape: bf16[8,8,128], index: 0, kind: input, shape index: {}]   ;;  %s4016_s1 = inlined_call_operand.hbm [shape: bf16[2,128,512], index: 1, kind: input, shape index: {}]   ;;  %s4017_s2 = inlined_call_operand.hbm [shape: bf16[2,128,512], index: 2, kind: input, shape index: {}]   ;;  %s4018_s3 = inlined_call_operand.vmem [shape: f32[2,1,512], index: 3, kind: input, shape index: {}]   ;;  %s4019_s4 = inlined_call_operand.hbm [shape: f32[8,8,256], index: 4, kind: output, shape index: {0}]   ;;  %s4020_s5 = inlined_call_operand.hbm [shape: f32[2,8,128], index: 5, kind: output, shape index: {1}]   ;;  %s4021_s6 = inlined_call_operand.hbm [shape: f32[2,8,128], index: 6, kind: output, shape index: {2}]  }
   0x1   :  { %4038 = sst [smem:[#allocation21_spill]] %s4015_s0 }
   0x2   :  { %4039 = sst [smem:[#allocation22_spill]] %s4016_s1 }
   0x3   :  { %12 = vsyncpa [#allocation4], 0 }
   0x4   :  { %14 = vsyncpa [#allocation4 + $0x1], 0 }
   0x5   :  { %15 = vsyncpa [#allocation7], 0 }
   0x6   :  { %17 = vsyncpa [#allocation7 + $0x1], 0 }
   0x7   :  { %18 = vsyncpa [#allocation5], 0 }
   0x8   :  { %20 = vsyncpa [#allocation5 + $0x1], 0 }
   0x9   :  { %21 = vsyncpa [#allocation11], 0 }
   0xa   :  { %23 = vsyncpa [#allocation11 + $0x1], 0  ;;  %s3040_s21 = smov 0   ;;  %s3042_s22 = smov 0  }
   0xb   :  { %s3044_s23 = smov 0   ;;  %s3046_s24 = smov 0  }
   0xc   :  { %s3048_s25 = smov 0   ;;  %s3050_s26 = smov 0  }
   0xd LB: > { %4040 = sst [smem:[#allocation17_spill]] %s2976_s23  ;;  %s3071_s27 = sadd.s32 4294967295, %s2988_s26   ;;  %s2988_s26 = sphi %s3050_s26, %s29_s26   ;;  %s2984_s25 = sphi %s3048_s25, %s4073_s25   ;;  %s2980_s24 = sphi %s3046_s24, %s4072_s24   ;;  %s2976_s23 = sphi %s3044_s23, %s4071_s23   ;;  %s2972_s22 = sphi %s3042_s22, %s4075_s22   ;;  %s2968_s21 = sphi %s3040_s21, %s4074_s21  }
   0xe   : > { %4041 = sst [smem:[#allocation18_spill]] %s2984_s25  ;;  %s4022_s28 = sadd.s32 4294967294, %s2988_s26  }
   0xf   : > { %s41_s29 = sadd.s32 1, %s2984_s25  ;;  %s80_s30 = sadd.s32 1, %s2976_s23 }
  0x10   : > { %p43_p0 = scmp.ge.s32.totalorder %s41_s29, 2  ;;  %p87_p1 = scmp.ne.s32.totalorder %s2976_s23, %s2972_s22 }
  0x11   : > { %p4026_p2 = scmp.eq.s32.totalorder %s2988_s26, 0  ;;  %p93_p3 = scmp.ne.s32.totalorder %s2972_s22, %s2968_s21 }
  0x12   : > { %s4077_s29 = smov (%p43_p0, %s41_s29), 0  ;;  %p4024_p5 = scmp.eq.s32.totalorder %s3071_s27, 0 }
  0x13   : > { %4042 = sst [smem:[#allocation19_spill]] %s4077_s29  ;;  %p3085_p4 = por %p4026_p2, %p87_p1 }
  0x14   : > { %s77_s8 = ssub.s32 %s2984_s25, %s4077_s29  ;;  %p177_p6 = scmp.eq.s32.totalorder %s3071_s27, 1 }
  0x15   : > { %p78_p7 = scmp.eq.s32.totalorder %s77_s8, 0  ;;  %p3095_p8 = por %p4024_p5, %p93_p3 }
  0x16   : > { %p3099_p9 = por %p177_p6, %p87_p1  ;;  %p183_p10 = scmp.eq.s32.totalorder %s4022_s28, 1 }
  0x17   : > { %s4044_s9 = scalar_select %p3095_p8, 1, 0 }
  0x18   : > { %s4045_s10 = scalar_select %p3099_p9, 1, 0 }
  0x19   : > { %s3106_s11 = scalar_select %p78_p7, %s2976_s23, %s80_s30  }
  0x1a   : > { %p3108_p11 = por %p183_p10, %p93_p3  ;;  %p4025_p13 = scmp.lt.s32.totalorder %s2988_s26, 2 }
  0x1b   : > { %4046 = sst [smem:[#allocation20_spill]] %s3106_s11  ;;  %s279_s13 = sand.u32 1, %s2988_s26  }
  0x1c   : > { %s4047_s12 = scalar_select %p3108_p11, 1, 0 }
  0x1d   : > { %s281_s14 = sand.u32 1, %s2976_s23   ;;  %s4023_s16 = sshll.u32 %s2984_s25, 12 }
  0x1e   : > { %s3116_s15 = sshll.u32 %s281_s14, 8  ;;  %s4048_s1 = sld [smem:[#allocation22_spill]] }
  0x1f   : > { %s283_s20 = scalar_lea.vmem [#allocation6], %s3116_s15  ;;  %p3133_p0 = pnand %p4025_p13, %p3085_p4 }
  0x20   : > { %s290_s30 = sshll.u32 %s283_s20, 4  ;;  %s3137_s14 = scalar_lea.sflag [#allocation7], %s279_s13  ;;  %s3127_s30 = int_to_ptr.vmem [resolvable:$true] %s290_s30 }
  0x21   : > { %s4049_s8 = scalar_select %p3133_p0, 1, 0 }
  0x22   : > { %p4031_p3 = pneg %p3133_p0 }
  0x24   : > { %s3124_s19 = scalar_lea.hbm %s4048_s1, %s4023_s16  ;;  %s2759_s7 = scalar_lea.hbm %s4048_s1, 8192 }
  0x25   : > { %s2754_s17 = scalar_lea.hbm %s3124_s19, 4096  ;;  %p2760_p4 = scmp.lt.u32.totalorder %s3124_s19, %s4048_s1 }
  0x26   : > { %p2755_p1 = scmp.ne.s32.totalorder %s3124_s19, %s2754_s17  ;;  %p2761_p10 = scmp.lt.u32.totalorder %s2759_s7, %s2754_s17 }
  0x27   : > { %p2763_p5 = scmp.lt.u32.totalorder %s2754_s17, %s3124_s19 }
  0x28   : > { %p2757_p6 = pnand %p4031_p3, %p2755_p1  ;;  %p2762_p12 = por %p2761_p10, %p2760_p4 }
  0x2a   : > { %p2758_p7 = pneg %p2757_p6  ;;  %p2764_p13 = por %p2763_p5, %p2762_p12 }
  0x2c   : > { %p2765_p2 = pnand %p2764_p13, %p2758_p7 }
  0x2e   : > { %2768 = shalt.err (!%p2765_p2)
}
  0x2f   : > { %s2769_s13 = scalar_lea.vmem %s3127_s30, 4096  ;;  %s2990_s18 = smov [#allocation6]  }
  0x30   : > { %p2770_p1 = scmp.ne.s32.totalorder %s3127_s30, %s2769_s13  ;;  %s2774_s20 = sshll.u32 %s2990_s18, 4  ;;  %s2775_s20 = int_to_ptr.vmem [resolvable:$false] %s2774_s20 }
  0x31   : > { %s2776_s28 = scalar_lea.vmem %s2775_s20, 8192  ;;  %p2777_p9 = scmp.lt.s32.totalorder %s3127_s30, %s2775_s20 }
  0x32   : > { %p2772_p6 = pnand %p2770_p1, %p4031_p3  ;;  %p2778_p4 = scmp.lt.s32.totalorder %s2776_s28, %s2769_s13 }
  0x34   : > { %p2773_p11 = pneg %p2772_p6  ;;  %p2779_p10 = por %p2778_p4, %p2777_p9 }
  0x36   : > { %p2780_p5 = pnand %p2779_p10, %p2773_p11 }
  0x38   : > { %2783 = shalt.err (!%p2780_p5)
}
  0x39   : > { %s4030_s16 = smov 256   ;;  %s4035_s17 = smov 16  }
  0x3a   : > { %2466 = dma.hbm_to_vmem [thread:$0]  (!%p3133_p0), %s3124_s19, 4096, %s3127_s30, %s3137_s14, %s4030_s16, %s4030_s16, %s4035_s17  }
  0x3b   : > { %s4050_s7 = sshll.u32 %s2984_s25, 12  ;;  %s304_s28 = scalar_lea.vmem [#allocation8], %s3116_s15 }
  0x3c   : > { %s3173_s20 = scalar_lea.hbm %s4017_s2, %s4050_s7  ;;  %s311_s1 = sshll.u32 %s304_s28, 4  ;;  %s3176_s1 = int_to_ptr.vmem [resolvable:$true] %s311_s1 }
  0x3d   : > { %p2324_p2 = scmp.ge.s32.totalorder %s2988_s26, 1  ;;  %p326_p9 = scmp.lt.s32.totalorder %s2988_s26, 3 }
  0x3e   : > { %s2993_s11 = smov [#allocation3]   ;;  %p4052_p12 = scmp.eq.s32.totalorder %s2988_s26, 0 }
  0x3f   : > { %p3180_p11 = pnand %p2324_p2, %p326_p9  ;;  %s269_s23 = sshll.u32 %s2993_s11, 4  ;;  %s270_s23 = int_to_ptr.vmem [resolvable:$true] %s269_s23 }
  0x40   : > { %p4053_p13 = scmp.lt.s32.totalorder %s2988_s26, 2  ;;  %s4055_s0 = sld [smem:[#allocation21_spill]] }
  0x41   : > { %s4051_s29 = scalar_select %p3180_p11, 1, 0 }
  0x42   : > { %p3188_p7 = pnand %p4053_p13, %p4052_p12 }
  0x44   : > { %p2786_p6 = pneg %p3188_p7 }
  0x46   : > { %s2784_s7 = scalar_lea.hbm %s4055_s0, 512 }
  0x47   : > { %p2785_p1 = scmp.ne.s32.totalorder %s4055_s0, %s2784_s7  ;;  %p2791_p5 = scmp.lt.u32.totalorder %s2784_s7, %s4055_s0 }
  0x49   : > { %p2787_p4 = pnand %p2786_p6, %p2785_p1 }
  0x4b   : > { %p2788_p10 = pneg %p2787_p4 }
  0x4d   : > { %p2793_p2 = pnand %p2791_p5, %p2788_p10 }
  0x4f   : > { %2796 = shalt.err (!%p2793_p2)
}
  0x50   : > { %s2797_s16 = scalar_lea.vmem %s270_s23, 512  ;;  %s2804_s30 = scalar_lea.vmem %s270_s23, 1024 }
  0x51   : > { %p2798_p9 = scmp.ne.s32.totalorder %s270_s23, %s2797_s16  ;;  %p2805_p3 = scmp.lt.s32.totalorder %s270_s23, %s270_s23 }
  0x52   : > { %p2806_p8 = scmp.lt.s32.totalorder %s2804_s30, %s2797_s16 }
  0x53   : > { %p2800_p12 = pnand %p2798_p9, %p2786_p6 }
  0x54   : > { %p2807_p11 = por %p2806_p8, %p2805_p3 }
  0x55   : > { %p2801_p13 = pneg %p2800_p12 }
  0x57   : > { %p2808_p0 = pnand %p2807_p11, %p2801_p13 }
  0x59   : > { %2811 = shalt.err (!%p2808_p0)
}
  0x5a   : > { %s2994_s15 = smov 64   ;;  %s2995_s7 = smov 4  }
  0x5b   : > { %2463 = dma.hbm_to_vmem [thread:$0]  (!%p3188_p7), %s4055_s0, 512, %s270_s23, [#allocation4], %s2994_s15, %s2994_s15, %s2995_s7  }
  0x5c   : > { %s2812_s11 = scalar_lea.hbm %s3173_s20, 4096  ;;  %p4056_p6 = scmp.ne.s32.totalorder %s4049_s8, 0 }
  0x5d   : > { %p2813_p1 = scmp.ne.s32.totalorder %s3173_s20, %s2812_s11  ;;  %s2817_s30 = scalar_lea.hbm %s4017_s2, 8192 }
  0x5e   : > { %p4057_p4 = pneg %p4056_p6  ;;  %p2818_p0 = scmp.lt.u32.totalorder %s3173_s20, %s4017_s2 }
  0x5f   : > { %p2819_p11 = scmp.lt.u32.totalorder %s2817_s30, %s2812_s11  ;;  %p2821_p5 = scmp.lt.u32.totalorder %s2812_s11, %s3173_s20 }
  0x60   : > { %p2815_p8 = pnand %p2813_p1, %p4057_p4 }
  0x61   : > { %p2820_p10 = por %p2819_p11, %p2818_p0 }
  0x62   : > { %p2816_p3 = pneg %p2815_p8 }
  0x63   : > { %p2822_p2 = por %p2821_p5, %p2820_p10 }
  0x65   : > { %p2823_p9 = pnand %p2822_p2, %p2816_p3 }
  0x67   : > { %2826 = shalt.err (!%p2823_p9)
}
  0x68   : > { %s2827_s23 = scalar_lea.vmem %s3176_s1, 4096  ;;  %p4058_p12 = pmov %p4057_p4 }
  0x69   : > { %p2828_p7 = scmp.ne.s32.totalorder %s3176_s1, %s2827_s23  ;;  %s2996_s19 = smov [#allocation8]  }
  0x6a   : > { %s2832_s15 = sshll.u32 %s2996_s19, 4  ;;  %s2833_s15 = int_to_ptr.vmem [resolvable:$false] %s2832_s15 }
  0x6b   : > { %p2830_p13 = pnand %p2828_p7, %p4058_p12  ;;  %s2834_s25 = scalar_lea.vmem %s2833_s15, 8192 }
  0x6c   : > { %p2835_p4 = scmp.lt.s32.totalorder %s3176_s1, %s2833_s15  ;;  %p2836_p8 = scmp.lt.s32.totalorder %s2834_s25, %s2827_s23 }
  0x6d   : > { %p2831_p1 = pneg %p2830_p13 }
  0x6e   : > { %p2837_p0 = por %p2836_p8, %p2835_p4 }
  0x70   : > { %p2838_p11 = pnand %p2837_p0, %p2831_p1 }
  0x72   : > { %2841 = shalt.err (!%p2838_p11)
}
  0x73   : > { %s4059_s17 = smov 16   ;;  %s4060_s7 = smov 256  }
  0x74   : > { %2469 = dma.hbm_to_vmem [thread:$0]  (!%p4056_p6), %s3173_s20, 4096, %s3176_s1, %s3137_s14, %s4060_s7, %s4060_s7, %s4059_s17  }
  0x75   : > { %p4061_p3 = scmp.ne.s32.totalorder %s4051_s29, 0 }
  0x76   : > { %p4062_p10 = scmp.eq.s32.totalorder (!%p4061_p3), %s3071_s27, 0 }
  0x77   : > { %330 = sbr.rel (%p4061_p3) target bundleno = 2276 (0x8e4), region = 36 }
  0x7e   : > { %2951 = dma.done.wait (%p4062_p10), [#allocation4], 512   ;;  %p4063_p5 = pmov %p4062_p10 }
  0x7f   : > { %s4037_s8 = sand.u32 1, %s3071_s27   ;;  %s3243_s13 = sand.u32 1, %s2972_s22  }
  0x80   : > { %2953 = vsyncadd (%p4063_p5), [#allocation4], 4294966784  ;;  %s2326_s18 = sshll.u32 %s3243_s13, 8  ;;  %s342_s1 = scalar_lea.sflag [#allocation7], %s4037_s8 }
  0x81   : > { %s3250_s29 = scalar_lea.vmem [#allocation6], %s2326_s18  ;;  %p4064_p6 = scmp.ne.s32.totalorder %s4044_s9, 0 }
  0x83   : > { %2955 = dma.done.wait (%p4064_p6), %s342_s1, 8192  }
  0x84   : > { %2957 = vsyncadd (%p4064_p6), %s342_s1, 4294959104  ;;  %v2997_v0 = vmov 0   ;;  %v2542_v1 = vld [vmem:[%s3250_s29 + $0x4] ss:$16 sps:$4 sm:$0xff]   ;;  %v2544_v2 = vld [vmem:[%s3250_s29 + $0xc] ss:$16 sps:$4 sm:$0xff]  }
  0x85   : > { %736 = vmatprep.mubr.bf16.mxu0 %v2997_v0  ;;  %809 = vmatprep.mubr.bf16.mxu1 %v2997_v0  ;;  %v2546_v3 = vld [vmem:[%s3250_s29] ss:$16 sps:$4 sm:$0xff]   ;;  %v2547_v4 = vld [vmem:[%s3250_s29 + $0x8] ss:$16 sps:$4 sm:$0xff]   ;;  %v2548_v5 = vld [vmem:[%s3250_s29 + $0x24] ss:$16 sps:$4 sm:$0xff]  }
  0x86   : > { %704 = vmatprep.subr.bf16.mxu0 %v2542_v1  ;;  %777 = vmatprep.subr.bf16.mxu1 %v2544_v2  ;;  %v2550_v6 = vld [vmem:[%s3250_s29 + $0x2c] ss:$16 sps:$4 sm:$0xff]   ;;  %v2552_v7 = vld [vmem:[%s3250_s29 + $0x20] ss:$16 sps:$4 sm:$0xff]   ;;  %v2553_v8 = vld [vmem:[%s3250_s29 + $0x28] ss:$16 sps:$4 sm:$0xff]  }
  0x87   : > { %705 = vmatpush1.bf16.msra.mxu0 %v2546_v3  ;;  %778 = vmatpush1.bf16.msra.mxu1 %v2547_v4  ;;  %v2554_v9 = vld [vmem:[%s3250_s29 + $0x44] ss:$16 sps:$4 sm:$0xff]   ;;  %v2556_v10 = vld [vmem:[%s3250_s29 + $0x4c] ss:$16 sps:$4 sm:$0xff]   ;;  %v2558_v11 = vld [vmem:[%s3250_s29 + $0x40] ss:$16 sps:$4 sm:$0xff]  }
  0x88   : > { %706 = vmatprep.subr.bf16.mxu0 %v2548_v5  ;;  %779 = vmatprep.subr.bf16.mxu1 %v2550_v6  ;;  %v2559_v12 = vld [vmem:[%s3250_s29 + $0x48] ss:$16 sps:$4 sm:$0xff]   ;;  %v2560_v13 = vld [vmem:[%s3250_s29 + $0x64] ss:$16 sps:$4 sm:$0xff]   ;;  %v2562_v14 = vld [vmem:[%s3250_s29 + $0x6c] ss:$16 sps:$4 sm:$0xff]  }
  0x89   : > { %v2564_v15 = vld [vmem:[%s3250_s29 + $0x60] ss:$16 sps:$4 sm:$0xff]   ;;  %v2565_v16 = vld [vmem:[%s3250_s29 + $0x68] ss:$16 sps:$4 sm:$0xff]   ;;  %v2566_v17 = vld [vmem:[%s3250_s29 + $0x84] ss:$16 sps:$4 sm:$0xff]  }
  0x8a   : > { %v2568_v18 = vld [vmem:[%s3250_s29 + $0x8c] ss:$16 sps:$4 sm:$0xff]   ;;  %v2570_v19 = vld [vmem:[%s3250_s29 + $0x80] ss:$16 sps:$4 sm:$0xff]   ;;  %v2571_v20 = vld [vmem:[%s3250_s29 + $0x88] ss:$16 sps:$4 sm:$0xff]  }
  0x8b   : > { %707 = vmatpush1.bf16.msra.mxu0 %v2552_v7  ;;  %780 = vmatpush1.bf16.msra.mxu1 %v2553_v8  ;;  %v2572_v21 = vld [vmem:[%s3250_s29 + $0xa4] ss:$16 sps:$4 sm:$0xff]   ;;  %v2574_v22 = vld [vmem:[%s3250_s29 + $0xac] ss:$16 sps:$4 sm:$0xff]   ;;  %v2576_v23 = vld [vmem:[%s3250_s29 + $0xa0] ss:$16 sps:$4 sm:$0xff]   ;;  %v500_v7 = vlaneseq }
  0x8c   : > { %708 = vmatprep.subr.bf16.mxu0 %v2554_v9  ;;  %781 = vmatprep.subr.bf16.mxu1 %v2556_v10  ;;  %v2577_v24 = vld [vmem:[%s3250_s29 + $0xa8] ss:$16 sps:$4 sm:$0xff]   ;;  %v2578_v25 = vld [vmem:[%s3250_s29 + $0xc4] ss:$16 sps:$4 sm:$0xff]   ;;  %v2580_v26 = vld [vmem:[%s3250_s29 + $0xcc] ss:$16 sps:$4 sm:$0xff]  }
  0x8d   : > { %s3286_s9 = scalar_lea.vmem [#allocation8], %s2326_s18  ;;  %v2582_v27 = vld [vmem:[%s3250_s29 + $0xc0] ss:$16 sps:$4 sm:$0xff]   ;;  %v2583_v28 = vld [vmem:[%s3250_s29 + $0xc8] ss:$16 sps:$4 sm:$0xff]   ;;  %v2998_v6 = vmov 0.0|0.0  }
  0x8e   : > { %v2584_v29 = vld [vmem:[%s3250_s29 + $0xe4] ss:$16 sps:$4 sm:$0xff]   ;;  %v2586_v30 = vld [vmem:[%s3250_s29 + $0xec] ss:$16 sps:$4 sm:$0xff]   ;;  %v2588_v31 = vld [vmem:[%s3250_s29 + $0xe0] ss:$16 sps:$4 sm:$0xff]  }
  0x8f   : > { %709 = vmatpush1.bf16.msra.mxu0 %v2558_v11  ;;  %782 = vmatpush1.bf16.msra.mxu1 %v2559_v12  ;;  %v2589_v32 = vld [vmem:[%s3250_s29 + $0xe8] ss:$16 sps:$4 sm:$0xff]   ;;  %v3295_v33 = vld [vmem:[%s3286_s9 + $0x4] ss:$16 sps:$4 sm:$0xff]   ;;  %v3298_v34 = vld [vmem:[%s3286_s9 + $0xc] ss:$16 sps:$4 sm:$0xff]  }
  0x90   : > { %710 = vmatprep.subr.bf16.mxu0 %v2560_v13  ;;  %783 = vmatprep.subr.bf16.mxu1 %v2562_v14  ;;  %v2590_v35 = vld [vmem:[#allocation3] sm:$0xff]   ;;  %v3304_v37 = vld [vmem:[%s3286_s9 + $0x8] ss:$16 sps:$4 sm:$0xff]   ;;  %v3312_v39 = vld [vmem:[%s3286_s9 + $0x2c] ss:$16 sps:$4 sm:$0xff]   ;;  %s2403_s14 = sshll.u32 %s2980_s24, 1 }
  0x91   : > { %v3301_v36 = vld [vmem:[%s3286_s9] ss:$16 sps:$4 sm:$0xff]   ;;  %v3309_v38 = vld [vmem:[%s3286_s9 + $0x24] ss:$16 sps:$4 sm:$0xff]   ;;  %v3323_v42 = vld [vmem:[%s3286_s9 + $0x28] ss:$16 sps:$4 sm:$0xff]  }
  0x92   : > { %v3315_v40 = vld [vmem:[%s3286_s9 + $0x20] ss:$16 sps:$4 sm:$0xff]   ;;  %v3318_v41 = vld [vmem:[%s3286_s9 + $0x44] ss:$16 sps:$4 sm:$0xff]   ;;  %v3328_v43 = vld [vmem:[%s3286_s9 + $0x4c] ss:$16 sps:$4 sm:$0xff]  }
  0x93   : > { %711 = vmatpush1.bf16.msra.mxu0 %v2564_v15  ;;  %784 = vmatpush1.bf16.msra.mxu1 %v2565_v16  ;;  %v2600_v44 = vld [vmem:[#allocation3 + $0x8] sm:$0xff]   ;;  %v3333_v45 = vld [vmem:[%s3286_s9 + $0x40] ss:$16 sps:$4 sm:$0xff]   ;;  %v3343_v47 = vld [vmem:[%s3286_s9 + $0x64] ss:$16 sps:$4 sm:$0xff]   ;;  %s3468_s20 = smul.u32 7, %s2980_s24 }
  0x94   : > { %712 = vmatprep.subr.bf16.mxu0 %v2566_v17  ;;  %785 = vmatprep.subr.bf16.mxu1 %v2568_v18  ;;  %v3338_v46 = vld [vmem:[%s3286_s9 + $0x48] ss:$16 sps:$4 sm:$0xff]   ;;  %v3346_v48 = vld [vmem:[%s3286_s9 + $0x6c] ss:$16 sps:$4 sm:$0xff]   ;;  %v3349_v49 = vld [vmem:[%s3286_s9 + $0x60] ss:$16 sps:$4 sm:$0xff]  }
  0x95   : > { %v3354_v50 = vld [vmem:[%s3286_s9 + $0x84] ss:$16 sps:$4 sm:$0xff]   ;;  %v3357_v51 = vld [vmem:[%s3286_s9 + $0x68] ss:$16 sps:$4 sm:$0xff]   ;;  %v3362_v52 = vld [vmem:[%s3286_s9 + $0x8c] ss:$16 sps:$4 sm:$0xff]  }
  0x96   : > { %v2613_v53 = vld [vmem:[#allocation3 + $0x10] sm:$0xff]   ;;  %v3372_v55 = vld [vmem:[%s3286_s9 + $0x88] ss:$16 sps:$4 sm:$0xff]   ;;  %v3380_v57 = vld [vmem:[%s3286_s9 + $0xac] ss:$16 sps:$4 sm:$0xff]   ;;  %s3470_s11 = ssub.s32 1, %s2403_s14 }
  0x97   : > { %713 = vmatpush1.bf16.msra.mxu0 %v2570_v19  ;;  %786 = vmatpush1.bf16.msra.mxu1 %v2571_v20  ;;  %v3369_v54 = vld [vmem:[%s3286_s9 + $0x80] ss:$16 sps:$4 sm:$0xff]   ;;  %v3377_v56 = vld [vmem:[%s3286_s9 + $0xa4] ss:$16 sps:$4 sm:$0xff]   ;;  %v3388_v59 = vld [vmem:[%s3286_s9 + $0xa8] ss:$16 sps:$4 sm:$0xff]  }
  0x98   : > { %714 = vmatprep.subr.bf16.mxu0 %v2572_v21  ;;  %787 = vmatprep.subr.bf16.mxu1 %v2574_v22  ;;  %v3385_v58 = vld [vmem:[%s3286_s9 + $0xa0] ss:$16 sps:$4 sm:$0xff]   ;;  %v3393_v60 = vld [vmem:[%s3286_s9 + $0xc4] ss:$16 sps:$4 sm:$0xff]   ;;  %v3396_v61 = vld [vmem:[%s3286_s9 + $0xcc] ss:$16 sps:$4 sm:$0xff]  }
  0x99   : > { %v2626_v62 = vld [vmem:[#allocation3 + $0x18] sm:$0xff]   ;;  %v3403_v63 = vld [vmem:[%s3286_s9 + $0xc0] ss:$16 sps:$4 sm:$0xff]   ;;  %v3411_v2 = vld [vmem:[%s3286_s9 + $0xe4] ss:$16 sps:$4 sm:$0xff]   ;;  %s1629_s16 = smul.u32 5, %s3470_s11 }
  0x9a   : > { %v3406_v1 = vld [vmem:[%s3286_s9 + $0xc8] ss:$16 sps:$4 sm:$0xff]   ;;  %v3414_v3 = vld [vmem:[%s3286_s9 + $0xec] ss:$16 sps:$4 sm:$0xff]   ;;  %v3419_v4 = vld [vmem:[%s3286_s9 + $0xe0] ss:$16 sps:$4 sm:$0xff]  }
  0x9b   : > { %715 = vmatpush1.bf16.msra.mxu0 %v2576_v23  ;;  %788 = vmatpush1.bf16.msra.mxu1 %v2577_v24  ;;  %v3422_v5 = vld [vmem:[%s3286_s9 + $0xe8] ss:$16 sps:$4 sm:$0xff]   ;;  %s1746_s28 = smul.u32 6, %s3470_s11  ;;  %s3475_s30 = sadd.s32 %s1629_s16, %s3468_s20  ;;  %v501_v8 = vshrl.u32 %v500_v7, 7 }
  0x9c   : > { %716 = vmatprep.subr.bf16.mxu0 %v2578_v25  ;;  %789 = vmatprep.subr.bf16.mxu1 %v2580_v26  ;;  %s1863_s23 = smul.u32 7, %s3470_s11  ;;  %s2407_s25 = sshll.u32 %s3470_s11, 1 }
  0x9d   : > { %s3479_s19 = sadd.s32 %s1746_s28, %s3468_s20  ;;  %s3486_s17 = sadd.s32 %s2407_s25, %s3468_s20  ;;  %v502_v9 = vsub.s32 0, %v501_v8  ;;  %v510_v10 = vsub.s32 2, %v501_v8  ;;  %v506_v12 = vsub.s32 1, %v501_v8  ;;  %v514_v13 = vsub.s32 3, %v501_v8 }
  0x9e   : > { %s3482_s15 = sadd.s32 %s1863_s23, %s3468_s20  ;;  %s1395_s7 = smul.u32 3, %s3470_s11 }
  0x9f   : > { %717 = vmatpush1.bf16.msra.mxu0 %v2582_v27  ;;  %790 = vmatpush1.bf16.msra.mxu1 %v2583_v28  ;;  %s2414_s18 = sshll.u32 %s3470_s11, 2  ;;  %p411_p2 = scmp.lt.s32.totalorder %s2980_s24, 1 }
  0xa0   : > { %718 = vmatprep.subr.bf16.mxu0 %v2584_v29  ;;  %791 = vmatprep.subr.bf16.mxu1 %v2586_v30  ;;  %s3491_s1 = sadd.s32 %s1395_s7, %s3468_s20  ;;  %s3494_s29 = sadd.s32 %s2414_s18, %s3468_s20 }
  0xa1   : > { %s412_s14 = scalar_select %p411_p2, %s2980_s24, 1 }
  0xa2   : > { %s2438_s0 = smul.u32 224, %s2980_s24  ;;  %s2328_s23 = sshll.u32 %s3243_s13, 6 }
  0xa3   : > { %719 = vmatpush1.bf16.msra.mxu0 %v2588_v31  ;;  %792 = vmatpush1.bf16.msra.mxu1 %v2589_v32  ;;  %s2331_s8 = sshll.u32 %s412_s14, 2  ;;  %s2402_s25 = smul.u32 56, %s2980_s24 }
  0xa4   : > { %1053 = vmatprep.subr.bf16.mxu0 %v3295_v33  ;;  %1094 = vmatprep.subr.bf16.mxu1 %v3298_v34  ;;  %s414_s28 = scalar_lea.vmem %s4018_s3, %s2331_s8  ;;  %s887_s8 = scalar_lea.vmem [#allocation2], %s2438_s0 }
  0xa5   : > { %v490_v11 = vld [vmem:[%s414_s28] sm:$0xf]  ;;  %s3547_s7 = scalar_lea.vmem [#allocation9], %s2328_s23  ;;  %s3586_s14 = sadd.s32 %s3470_s11, %s3468_s20 }
  0xa6   : > { %737 = vmatmul.mubr.bf16.vlgmr.msra.gmra.mrb[0].mxu0 %v2590_v35  ;;  %810 = vmatmul.mubr.bf16.vlgmr.msra.gmra.mrb[0].mxu1 %v2590_v35  ;;  %v3501_v14 = vrot.slane %v490_v11, %v502_v9  ;;  %v3503_v15 = vrot.slane %v490_v11, %v510_v10  ;;  %v3505_v16 = vrot.slane %v490_v11, %v506_v12  ;;  %s1158_s18 = scalar_lea.vmem %s3547_s7, %s2402_s25 [#allocation9]  ;;  %s2439_s16 = sshll.u32 %s3586_s14, 5 }
  0xa7   : > { %1054 = vmatpush1.bf16.msra.mxu0 %v3301_v36  ;;  %1095 = vmatpush1.bf16.msra.mxu1 %v3304_v37  ;;  %v3507_v17 = vrot.slane %v490_v11, %v514_v13  ;;  %s1165_s28 = scalar_lea.vmem [#allocation2], %s2439_s16  ;;  %s2406_s20 = sshll.u32 %s3586_s14, 3 }
  0xa8   : > { %1055 = vmatprep.subr.bf16.mxu0 %v3309_v38  ;;  %746 = vmatprep.mubr.bf16.mxu0 %v2997_v0  ;;  %s1276_s11 = scalar_lea.vmem %s3547_s7, %s2406_s20 [#allocation9]  ;;  %s2440_s0 = sshll.u32 %s3486_s17, 5 }
  0xa9   : > { %819 = vmatprep.mubr.bf16.mxu1 %v2997_v0  ;;  %1096 = vmatprep.subr.bf16.mxu1 %v3312_v39  ;;  %s2410_s23 = sshll.u32 %s3486_s17, 3  ;;  %s2441_s17 = sshll.u32 %s3491_s1, 5 }
  0xaa   : > { %s1393_s25 = scalar_lea.vmem %s3547_s7, %s2410_s23 [#allocation9]  ;;  %s2413_s14 = sshll.u32 %s3491_s1, 3 }
  0xab   : > { %1056 = vmatpush1.bf16.msra.mxu0 %v3315_v40  ;;  %1097 = vmatpush1.bf16.msra.mxu1 %v3323_v42  ;;  %s1510_s16 = scalar_lea.vmem %s3547_s7, %s2413_s14 [#allocation9]  ;;  %s2442_s1 = sshll.u32 %s3494_s29, 5 }
  0xac   : > { %1057 = vmatprep.subr.bf16.mxu0 %v3318_v41  ;;  %1098 = vmatprep.subr.bf16.mxu1 %v3328_v43  ;;  %s2417_s20 = sshll.u32 %s3494_s29, 3  ;;  %s2443_s29 = sshll.u32 %s3475_s30, 5 }
  0xad   : > { %p4066_p7 = scmp.ne.s32.totalorder %s4045_s10, 0 }
  0xae   : > { %747 = vmatmul.mubr.bf16.gmra.mrb[4].mxu0 %v2600_v44  ;;  %820 = vmatmul.mubr.bf16.gmra.mrb[4].mxu1 %v2600_v44 }
  0xaf   : > { %1058 = vmatpush1.bf16.msra.mxu0 %v3333_v45  ;;  %1099 = vmatpush1.bf16.msra.mxu1 %v3338_v46 }
  0xb0   : > { %1059 = vmatprep.subr.bf16.mxu0 %v3343_v47  ;;  %756 = vmatprep.mubr.bf16.mxu0 %v2997_v0 }
  0xb1   : > { %829 = vmatprep.mubr.bf16.mxu1 %v2997_v0  ;;  %1100 = vmatprep.subr.bf16.mxu1 %v3346_v48 }
  0xb3   : > { %1060 = vmatpush1.bf16.msra.mxu0 %v3349_v49  ;;  %1101 = vmatpush1.bf16.msra.mxu1 %v3357_v51 }
  0xb4   : > { %1061 = vmatprep.subr.bf16.mxu0 %v3354_v50  ;;  %1102 = vmatprep.subr.bf16.mxu1 %v3362_v52 }
  0xb6   : > { %757 = vmatmul.mubr.bf16.gmra.mrb[8].mxu0 %v2613_v53  ;;  %830 = vmatmul.mubr.bf16.gmra.mrb[8].mxu1 %v2613_v53 }
  0xb7   : > { %1062 = vmatpush1.bf16.msra.mxu0 %v3369_v54  ;;  %1103 = vmatpush1.bf16.msra.mxu1 %v3372_v55 }
  0xb8   : > { %1063 = vmatprep.subr.bf16.mxu0 %v3377_v56  ;;  %766 = vmatprep.mubr.bf16.mxu0 %v2997_v0 }
  0xb9   : > { %839 = vmatprep.mubr.bf16.mxu1 %v2997_v0  ;;  %1104 = vmatprep.subr.bf16.mxu1 %v3380_v57 }
  0xbb   : > { %1064 = vmatpush1.bf16.msra.mxu0 %v3385_v58  ;;  %1105 = vmatpush1.bf16.msra.mxu1 %v3388_v59 }
  0xbc   : > { %1065 = vmatprep.subr.bf16.mxu0 %v3393_v60  ;;  %1106 = vmatprep.subr.bf16.mxu1 %v3396_v61 }
  0xbe   : > { %767 = vmatmul.mubr.bf16.gmra.mrb[12].mxu0 %v2626_v62  ;;  %840 = vmatmul.mubr.bf16.gmra.mrb[12].mxu1 %v2626_v62 }
  0xbf   : > { %1066 = vmatpush1.bf16.msra.mxu0 %v3403_v63  ;;  %1107 = vmatpush1.bf16.msra.mxu1 %v3406_v1 }
  0xc0   : > { %1067 = vmatprep.subr.bf16.mxu0 %v3411_v2  ;;  %1085 = vmatprep.mubr.bf16.mxu0 %v2997_v0 }
  0xc1   : > { %1108 = vmatprep.subr.bf16.mxu1 %v3414_v3  ;;  %1126 = vmatprep.mubr.bf16.mxu1 %v2997_v0 }
  0xc3   : > { %1068 = vmatpush1.bf16.msra.mxu0 %v3419_v4  ;;  %1109 = vmatpush1.bf16.msra.mxu1 %v3422_v5 }
  0xc4   : > { %1171 = vmatprep.subr.bf16.mxu0 %v3295_v33  ;;  %1212 = vmatprep.subr.bf16.mxu1 %v3298_v34 }
  0xc6   : > { %1086 = vmatmul.mubr.bf16.vlgmr.msra.gmra.mrb[16].mxu0 %v2998_v6  ;;  %1127 = vmatmul.mubr.bf16.vlgmr.msra.gmra.mrb[16].mxu1 %v2998_v6 }
  0xc7   : > { %1172 = vmatpush1.bf16.msra.mxu0 %v3301_v36  ;;  %1213 = vmatpush1.bf16.msra.mxu1 %v3304_v37 }
  0xc8   : > { %1173 = vmatprep.subr.bf16.mxu0 %v3309_v38  ;;  %1214 = vmatprep.subr.bf16.mxu1 %v3312_v39 }
  0xc9   : > { %1203 = vmatprep.mubr.bf16.mxu0 %v2997_v0  ;;  %1244 = vmatprep.mubr.bf16.mxu1 %v2997_v0 }
  0xcb   : > { %1174 = vmatpush1.bf16.msra.mxu0 %v3315_v40  ;;  %1215 = vmatpush1.bf16.msra.mxu1 %v3323_v42 }
  0xcc   : > { %1175 = vmatprep.subr.bf16.mxu0 %v3318_v41  ;;  %1216 = vmatprep.subr.bf16.mxu1 %v3328_v43 }
  0xcf   : > { %1176 = vmatpush1.bf16.msra.mxu0 %v3333_v45  ;;  %1217 = vmatpush1.bf16.msra.mxu1 %v3338_v46 }
  0xd0   : > { %1177 = vmatprep.subr.bf16.mxu0 %v3343_v47  ;;  %1218 = vmatprep.subr.bf16.mxu1 %v3346_v48 }
  0xd3   : > { %1178 = vmatpush1.bf16.msra.mxu0 %v3349_v49  ;;  %1219 = vmatpush1.bf16.msra.mxu1 %v3357_v51 }
  0xd4   : > { %1179 = vmatprep.subr.bf16.mxu0 %v3354_v50  ;;  %1220 = vmatprep.subr.bf16.mxu1 %v3362_v52 }
  0xd7   : > { %1180 = vmatpush1.bf16.msra.mxu0 %v3369_v54  ;;  %1221 = vmatpush1.bf16.msra.mxu1 %v3372_v55 }
  0xd8   : > { %1181 = vmatprep.subr.bf16.mxu0 %v3377_v56  ;;  %1222 = vmatprep.subr.bf16.mxu1 %v3380_v57 }
  0xdb   : > { %1182 = vmatpush1.bf16.msra.mxu0 %v3385_v58  ;;  %1223 = vmatpush1.bf16.msra.mxu1 %v3388_v59 }
  0xdc   : > { %1183 = vmatprep.subr.bf16.mxu0 %v3393_v60  ;;  %1224 = vmatprep.subr.bf16.mxu1 %v3396_v61 }
  0xdf   : > { %1184 = vmatpush1.bf16.msra.mxu0 %v3403_v63  ;;  %1225 = vmatpush1.bf16.msra.mxu1 %v3406_v1 }
  0xe0   : > { %1185 = vmatprep.subr.bf16.mxu0 %v3411_v2  ;;  %1226 = vmatprep.subr.bf16.mxu1 %v3414_v3 }
  0xe3   : > { %1186 = vmatpush1.bf16.msra.mxu0 %v3419_v4  ;;  %1227 = vmatpush1.bf16.msra.mxu1 %v3422_v5 }
  0xe4   : > { %1288 = vmatprep.subr.bf16.mxu0 %v3295_v33  ;;  %1329 = vmatprep.subr.bf16.mxu1 %v3298_v34 }
 0x179   : > { %v738_v18 = vpop.f32.mrb[0].mxu0  ;;  %v811_v19 = vpop.f32.mrb[0].mxu1 }
 0x17a   : > { %v739_v20 = vadd.f32 %v738_v18, %v3501_v14  ;;  %v812_v21 = vadd.f32 %v811_v19, %v3503_v15  ;;  %v740_v22 = vpop.f32.mrb[1].mxu0  ;;  %v813_v23 = vpop.f32.mrb[1].mxu1 }
 0x17b   : > { %v741_v24 = vadd.f32 %v740_v22, %v3505_v16  ;;  %v814_v25 = vadd.f32 %v813_v23, %v3507_v17  ;;  %v742_v26 = vpop.f32.mrb[2].mxu0  ;;  %v815_v27 = vpop.f32.mrb[2].mxu1 }
 0x17c   : > { %850 = vst [vmem:[#allocation2] sm:$0xff] %v739_v20  ;;  %852 = vst [vmem:[#allocation2 + $0x10] sm:$0xff] %v812_v21  ;;  %v743_v28 = vadd.f32 %v742_v26, %v3501_v14  ;;  %v816_v29 = vadd.f32 %v815_v27, %v3503_v15  ;;  %v744_v30 = vpop.f32.mrb[3].mxu0  ;;  %v817_v31 = vpop.f32.mrb[3].mxu1 }
 0x17d   : > { %851 = vst [vmem:[#allocation2 + $0x8] sm:$0xff] %v741_v24  ;;  %853 = vst [vmem:[#allocation2 + $0x18] sm:$0xff] %v814_v25  ;;  %v745_v32 = vadd.f32 %v744_v30, %v3505_v16  ;;  %v818_v35 = vadd.f32 %v817_v31, %v3507_v17 }
 0x17e   : > { %854 = vst [vmem:[#allocation2 + $0x20] sm:$0xff] %v743_v28  ;;  %856 = vst [vmem:[#allocation2 + $0x30] sm:$0xff] %v816_v29 }
 0x17f   : > { %855 = vst [vmem:[#allocation2 + $0x28] sm:$0xff] %v745_v32  ;;  %857 = vst [vmem:[#allocation2 + $0x38] sm:$0xff] %v818_v35 }
 0x181   : > { %v748_v44 = vpop.f32.mrb[4].mxu0  ;;  %v821_v53 = vpop.f32.mrb[4].mxu1 }
 0x182   : > { %v749_v62 = vadd.f32 %v748_v44, %v3501_v14  ;;  %v822_v6 = vadd.f32 %v821_v53, %v3503_v15  ;;  %v750_v7 = vpop.f32.mrb[5].mxu0  ;;  %v823_v8 = vpop.f32.mrb[5].mxu1 }
 0x183   : > { %v751_v9 = vadd.f32 %v750_v7, %v3505_v16  ;;  %v824_v10 = vadd.f32 %v823_v8, %v3507_v17  ;;  %v752_v11 = vpop.f32.mrb[6].mxu0  ;;  %v825_v12 = vpop.f32.mrb[6].mxu1 }
 0x184   : > { %858 = vst [vmem:[#allocation2 + $0x40] sm:$0xff] %v749_v62  ;;  %860 = vst [vmem:[#allocation2 + $0x50] sm:$0xff] %v822_v6  ;;  %v753_v13 = vadd.f32 %v752_v11, %v3501_v14  ;;  %v826_v18 = vadd.f32 %v825_v12, %v3503_v15  ;;  %v754_v19 = vpop.f32.mrb[7].mxu0  ;;  %v827_v20 = vpop.f32.mrb[7].mxu1 }
 0x185   : > { %859 = vst [vmem:[#allocation2 + $0x48] sm:$0xff] %v751_v9  ;;  %861 = vst [vmem:[#allocation2 + $0x58] sm:$0xff] %v824_v10  ;;  %v755_v21 = vadd.f32 %v754_v19, %v3505_v16  ;;  %v828_v22 = vadd.f32 %v827_v20, %v3507_v17 }
 0x186   : > { %862 = vst [vmem:[#allocation2 + $0x60] sm:$0xff] %v753_v13  ;;  %864 = vst [vmem:[#allocation2 + $0x70] sm:$0xff] %v826_v18 }
 0x187   : > { %863 = vst [vmem:[#allocation2 + $0x68] sm:$0xff] %v755_v21  ;;  %865 = vst [vmem:[#allocation2 + $0x78] sm:$0xff] %v828_v22 }
 0x189   : > { %v758_v23 = vpop.f32.mrb[8].mxu0  ;;  %v831_v24 = vpop.f32.mrb[8].mxu1 }
 0x18a   : > { %v759_v25 = vadd.f32 %v758_v23, %v3501_v14  ;;  %v832_v26 = vadd.f32 %v831_v24, %v3503_v15  ;;  %v760_v27 = vpop.f32.mrb[9].mxu0  ;;  %v833_v28 = vpop.f32.mrb[9].mxu1 }
 0x18b   : > { %v761_v29 = vadd.f32 %v760_v27, %v3505_v16  ;;  %v834_v30 = vadd.f32 %v833_v28, %v3507_v17  ;;  %v762_v31 = vpop.f32.mrb[10].mxu0  ;;  %v835_v32 = vpop.f32.mrb[10].mxu1 }
 0x18c   : > { %866 = vst [vmem:[#allocation2 + $0x80] sm:$0xff] %v759_v25  ;;  %868 = vst [vmem:[#allocation2 + $0x90] sm:$0xff] %v832_v26  ;;  %v763_v35 = vadd.f32 %v762_v31, %v3501_v14  ;;  %v836_v44 = vadd.f32 %v835_v32, %v3503_v15  ;;  %v764_v53 = vpop.f32.mrb[11].mxu0  ;;  %v837_v62 = vpop.f32.mrb[11].mxu1 }
 0x18d   : > { %867 = vst [vmem:[#allocation2 + $0x88] sm:$0xff] %v761_v29  ;;  %869 = vst [vmem:[#allocation2 + $0x98] sm:$0xff] %v834_v30  ;;  %v765_v6 = vadd.f32 %v764_v53, %v3505_v16  ;;  %v838_v7 = vadd.f32 %v837_v62, %v3507_v17 }
 0x18e   : > { %870 = vst [vmem:[#allocation2 + $0xa0] sm:$0xff] %v763_v35  ;;  %872 = vst [vmem:[#allocation2 + $0xb0] sm:$0xff] %v836_v44 }
 0x18f   : > { %871 = vst [vmem:[#allocation2 + $0xa8] sm:$0xff] %v765_v6  ;;  %873 = vst [vmem:[#allocation2 + $0xb8] sm:$0xff] %v838_v7 }
 0x191   : > { %v768_v8 = vpop.f32.mrb[12].mxu0  ;;  %v841_v9 = vpop.f32.mrb[12].mxu1 }
 0x192   : > { %v769_v10 = vadd.f32 %v768_v8, %v3501_v14  ;;  %v842_v11 = vadd.f32 %v841_v9, %v3503_v15  ;;  %v770_v12 = vpop.f32.mrb[13].mxu0  ;;  %v843_v13 = vpop.f32.mrb[13].mxu1 }
 0x193   : > { %v771_v18 = vadd.f32 %v770_v12, %v3505_v16  ;;  %v844_v19 = vadd.f32 %v843_v13, %v3507_v17  ;;  %v772_v20 = vpop.f32.mrb[14].mxu0  ;;  %v845_v21 = vpop.f32.mrb[14].mxu1 }
 0x194   : > { %874 = vst [vmem:[#allocation2 + $0xc0] sm:$0xff] %v769_v10  ;;  %876 = vst [vmem:[#allocation2 + $0xd0] sm:$0xff] %v842_v11  ;;  %v773_v22 = vadd.f32 %v772_v20, %v3501_v14  ;;  %v846_v23 = vadd.f32 %v845_v21, %v3503_v15  ;;  %v774_v24 = vpop.f32.mrb[15].mxu0  ;;  %v847_v25 = vpop.f32.mrb[15].mxu1 }
 0x195   : > { %875 = vst [vmem:[#allocation2 + $0xc8] sm:$0xff] %v771_v18  ;;  %877 = vst [vmem:[#allocation2 + $0xd8] sm:$0xff] %v844_v19  ;;  %v775_v26 = vadd.f32 %v774_v24, %v3505_v16  ;;  %v848_v27 = vadd.f32 %v847_v25, %v3507_v17 }
 0x196   : > { %878 = vst [vmem:[#allocation2 + $0xe0] sm:$0xff] %v773_v22  ;;  %880 = vst [vmem:[#allocation2 + $0xf0] sm:$0xff] %v846_v23 }
 0x197   : > { %879 = vst [vmem:[#allocation2 + $0xe8] sm:$0xff] %v775_v26  ;;  %881 = vst [vmem:[#allocation2 + $0xf8] sm:$0xff] %v848_v27 }
 0x199   : > { %v1087_v28 = vpop.f32.mrb[16].mxu0  ;;  %v1128_v29 = vpop.f32.mrb[16].mxu1 }
 0x19a   : > { %v1089_v30 = vpop.f32.mrb[17].mxu0  ;;  %v1130_v31 = vpop.f32.mrb[17].mxu1 }
 0x19b   : > { %v1091_v14 = vpop.f32.mrb[18].mxu0  ;;  %v1132_v32 = vpop.f32.mrb[18].mxu1 }
 0x19c   : > { %v1092_v15 = vpop.f32.mrb[19].mxu0  ;;  %v1133_v35 = vpop.f32.mrb[19].mxu1 }
 0x19e   : > { %v888_v44 = vld [vmem:[%s887_s8] sm:$0xff]  ;;  %v889_v53 = vld [vmem:[%s887_s8 + $0x8] sm:$0xff]  ;;  %v890_v6 = vld [vmem:[%s887_s8 + $0x10] sm:$0xff] }
 0x19f   : > { %v1135_v62 = vadd.f32 %v1087_v28, %v888_v44  ;;  %v1136_v16 = vadd.f32 %v1089_v30, %v889_v53  ;;  %v1137_v8 = vadd.f32 %v1128_v29, %v890_v6  ;;  %v891_v9 = vld [vmem:[%s887_s8 + $0x18] sm:$0xff]  ;;  %v1166_v14 = vld [vmem:[%s1165_s28] sm:$0xff]  ;;  %v1167_v44 = vld [vmem:[%s1165_s28 + $0x8] sm:$0xff]  ;;  %s1282_s8 = scalar_lea.vmem [#allocation2], %s2440_s0  ;;  %s1633_s0 = scalar_lea.vmem [#allocation2], %s2443_s29 }
 0x1a0   : > { %v1138_v10 = vadd.f32 %v1130_v31, %v891_v9 }
 0x1a1   : > { %v1139_v17 = vmul.f32 0.5, %v1135_v62  ;;  %v1143_v7 = vmul.f32 0.5, %v1136_v16 }
 0x1a2   : > { %v1148_v11 = vmul.f32 0.5, %v1138_v10  ;;  %v1168_v10 = vld [vmem:[%s1165_s28 + $0x10] sm:$0xff] }
 0x1a3   : > { %2642 = vtanh.f32 %v1139_v17 }
 0x1a4   : > { %2644 = vtanh.f32 %v1143_v7 }
 0x1a5   : > { %2646 = vtanh.f32 %v1137_v8 }
 0x1a6   : > { %2648 = vtanh.f32 %v1148_v11 }
 0x1ad   : > { %v2643_v12 = vpop.eup %2642 }
 0x1ae   : > { %v2645_v13 = vpop.eup %2644  ;;  %v1141_v18 = vmul.f32 0.5, %v2643_v12 }
 0x1af   : > { %v1145_v19 = vmul.f32 0.5, %v2645_v13  ;;  %v2647_v21 = vpop.eup %2646  ;;  %v1169_v13 = vld [vmem:[%s1165_s28 + $0x18] sm:$0xff]  ;;  %s1516_s28 = scalar_lea.vmem [#allocation2], %s2442_s1  ;;  %s2426_s1 = sshll.u32 %s3482_s15, 3 }
 0x1b0   : > { %v1142_v20 = vadd.f32 0.5, %v1141_v18  ;;  %v2649_v26 = vpop.eup %2648 }
 0x1b1   : > { %v1146_v22 = vadd.f32 0.5, %v1145_v19  ;;  %v1150_v27 = vmul.f32 0.5, %v2649_v26 }
 0x1b2   : > { %v1153_v23 = vmul.f32 %v2647_v21, %v1142_v20 }
 0x1b3   : > { %v1152_v24 = vmul.f32 0.0, %v1146_v22  ;;  %v1151_v28 = vadd.f32 0.5, %v1150_v27 }
 0x1b5   : > { %v3542_v25 = vadd.f32 %v1153_v23, %v1152_v24 }
 0x1b7   : > { %2650 = vtanh.f32 %v3542_v25 }
 0x1c1   : > { %v2651_v29 = vpop.eup %2650 }
 0x1c2   : > { %v1156_v30 = vmul.f32 %v2651_v29, %v1151_v28 }
 0x1c4   : > { %1159 = vst [vmem:[%s1158_s18] sm:$0xff] %v1156_v30  ;;  %v1170_v31 = vpack.c.bf16 %v1156_v30, %v1156_v30  ;;  %s1399_s18 = scalar_lea.vmem [#allocation2], %s2441_s17 }
 0x1c6   : > { %1204 = vmatmul.mubr.bf16.vlgmr.msra.gmra.mrb[20].mxu0 %v1170_v31  ;;  %1245 = vmatmul.mubr.bf16.vlgmr.msra.gmra.mrb[20].mxu1 %v1170_v31 }
 0x1c7   : > { %1289 = vmatpush1.bf16.msra.mxu0 %v3301_v36  ;;  %1330 = vmatpush1.bf16.msra.mxu1 %v3304_v37 }
 0x1c8   : > { %1290 = vmatprep.subr.bf16.mxu0 %v3309_v38  ;;  %1331 = vmatprep.subr.bf16.mxu1 %v3312_v39 }
 0x1c9   : > { %1320 = vmatprep.mubr.bf16.mxu0 %v2997_v0  ;;  %1361 = vmatprep.mubr.bf16.mxu1 %v2997_v0 }
 0x1cb   : > { %1291 = vmatpush1.bf16.msra.mxu0 %v3315_v40  ;;  %1332 = vmatpush1.bf16.msra.mxu1 %v3323_v42 }
 0x1cc   : > { %1292 = vmatprep.subr.bf16.mxu0 %v3318_v41  ;;  %1333 = vmatprep.subr.bf16.mxu1 %v3328_v43 }
 0x1cf   : > { %1293 = vmatpush1.bf16.msra.mxu0 %v3333_v45  ;;  %1334 = vmatpush1.bf16.msra.mxu1 %v3338_v46 }
 0x1d0   : > { %1294 = vmatprep.subr.bf16.mxu0 %v3343_v47  ;;  %1335 = vmatprep.subr.bf16.mxu1 %v3346_v48 }
 0x1d3   : > { %1295 = vmatpush1.bf16.msra.mxu0 %v3349_v49  ;;  %1336 = vmatpush1.bf16.msra.mxu1 %v3357_v51 }
 0x1d4   : > { %1296 = vmatprep.subr.bf16.mxu0 %v3354_v50  ;;  %1337 = vmatprep.subr.bf16.mxu1 %v3362_v52 }
 0x1d7   : > { %1297 = vmatpush1.bf16.msra.mxu0 %v3369_v54  ;;  %1338 = vmatpush1.bf16.msra.mxu1 %v3372_v55 }
 0x1d8   : > { %1298 = vmatprep.subr.bf16.mxu0 %v3377_v56  ;;  %1339 = vmatprep.subr.bf16.mxu1 %v3380_v57 }
 0x1db   : > { %1299 = vmatpush1.bf16.msra.mxu0 %v3385_v58  ;;  %1340 = vmatpush1.bf16.msra.mxu1 %v3388_v59 }
 0x1dc   : > { %1300 = vmatprep.subr.bf16.mxu0 %v3393_v60  ;;  %1341 = vmatprep.subr.bf16.mxu1 %v3396_v61 }
 0x1df   : > { %1301 = vmatpush1.bf16.msra.mxu0 %v3403_v63  ;;  %1342 = vmatpush1.bf16.msra.mxu1 %v3406_v1 }
 0x1e0   : > { %1302 = vmatprep.subr.bf16.mxu0 %v3411_v2  ;;  %1343 = vmatprep.subr.bf16.mxu1 %v3414_v3 }
 0x1e3   : > { %1303 = vmatpush1.bf16.msra.mxu0 %v3419_v4  ;;  %1344 = vmatpush1.bf16.msra.mxu1 %v3422_v5 }
 0x1e4   : > { %1405 = vmatprep.subr.bf16.mxu0 %v3295_v33  ;;  %1446 = vmatprep.subr.bf16.mxu1 %v3298_v34 }
 0x299   : > { %v1205_v32 = vpop.f32.mrb[20].mxu0  ;;  %v1246_v15 = vpop.f32.mrb[20].mxu1 }
 0x29a   : > { %v1253_v35 = vadd.f32 %v1205_v32, %v1166_v14  ;;  %v1207_v53 = vpop.f32.mrb[21].mxu0  ;;  %v1248_v62 = vpop.f32.mrb[21].mxu1  ;;  %v1255_v12 = vadd.f32 %v1246_v15, %v1168_v10 }
 0x29b   : > { %v1254_v16 = vadd.f32 %v1207_v53, %v1167_v44  ;;  %v1209_v6 = vpop.f32.mrb[22].mxu0  ;;  %v1250_v17 = vpop.f32.mrb[22].mxu1  ;;  %v1256_v18 = vadd.f32 %v1248_v62, %v1169_v13  ;;  %v1285_v62 = vld [vmem:[%s1282_s8 + $0x10] sm:$0xff] }
 0x29c   : > { %v1257_v7 = vmul.f32 0.5, %v1253_v35  ;;  %v1210_v8 = vpop.f32.mrb[23].mxu0  ;;  %v1251_v9 = vpop.f32.mrb[23].mxu1 }
 0x29d   : > { %v1261_v11 = vmul.f32 0.5, %v1254_v16  ;;  %v1266_v19 = vmul.f32 0.5, %v1256_v18  ;;  %v1286_v9 = vld [vmem:[%s1282_s8 + $0x18] sm:$0xff] }
 0x29e   : > { %2652 = vtanh.f32 %v1257_v7  ;;  %v1284_v7 = vld [vmem:[%s1282_s8 + $0x8] sm:$0xff] }
 0x29f   : > { %2654 = vtanh.f32 %v1261_v11 }
 0x2a0   : > { %2656 = vtanh.f32 %v1255_v12 }
 0x2a1   : > { %2658 = vtanh.f32 %v1266_v19 }
 0x2a8   : > { %v2653_v20 = vpop.eup %2652 }
 0x2a9   : > { %v2655_v21 = vpop.eup %2654  ;;  %v1259_v22 = vmul.f32 0.5, %v2653_v20 }
 0x2aa   : > { %v1263_v23 = vmul.f32 0.5, %v2655_v21  ;;  %v2657_v26 = vpop.eup %2656 }
 0x2ab   : > { %v1260_v24 = vadd.f32 0.5, %v1259_v22  ;;  %v2659_v31 = vpop.eup %2658 }
 0x2ac   : > { %v1264_v27 = vadd.f32 0.5, %v1263_v23  ;;  %v1268_v14 = vmul.f32 0.5, %v2659_v31 }
 0x2ad   : > { %v1271_v28 = vmul.f32 %v2657_v26, %v1260_v24 }
 0x2ae   : > { %v1270_v29 = vmul.f32 %v1264_v27, %v3542_v25  ;;  %v1269_v32 = vadd.f32 0.5, %v1268_v14  ;;  %v1283_v25 = vld [vmem:[%s1282_s8] sm:$0xff] }
 0x2b0   : > { %v3590_v30 = vadd.f32 %v1271_v28, %v1270_v29 }
 0x2b2   : > { %2660 = vtanh.f32 %v3590_v30 }
 0x2bc   : > { %v2661_v15 = vpop.eup %2660 }
 0x2bd   : > { %v1274_v35 = vmul.f32 %v2661_v15, %v1269_v32 }
 0x2bf   : > { %1277 = vst [vmem:[%s1276_s11] sm:$0xff] %v1274_v35  ;;  %v1287_v44 = vpack.c.bf16 %v1274_v35, %v1274_v35  ;;  %s1627_s11 = scalar_lea.vmem %s3547_s7, %s2417_s20 [#allocation9]  ;;  %s2431_s20 = sshll.u32 %s2980_s24, 7 }
 0x2c1   : > { %1321 = vmatmul.mubr.bf16.vlgmr.msra.gmra.mrb[24].mxu0 %v1287_v44  ;;  %1362 = vmatmul.mubr.bf16.vlgmr.msra.gmra.mrb[24].mxu1 %v1287_v44 }
 0x2c2   : > { %1406 = vmatpush1.bf16.msra.mxu0 %v3301_v36  ;;  %1447 = vmatpush1.bf16.msra.mxu1 %v3304_v37 }
 0x2c3   : > { %1407 = vmatprep.subr.bf16.mxu0 %v3309_v38  ;;  %1448 = vmatprep.subr.bf16.mxu1 %v3312_v39 }
 0x2c4   : > { %1437 = vmatprep.mubr.bf16.mxu0 %v2997_v0  ;;  %1478 = vmatprep.mubr.bf16.mxu1 %v2997_v0 }
 0x2c6   : > { %1408 = vmatpush1.bf16.msra.mxu0 %v3315_v40  ;;  %1449 = vmatpush1.bf16.msra.mxu1 %v3323_v42 }
 0x2c7   : > { %1409 = vmatprep.subr.bf16.mxu0 %v3318_v41  ;;  %1450 = vmatprep.subr.bf16.mxu1 %v3328_v43 }
 0x2ca   : > { %1410 = vmatpush1.bf16.msra.mxu0 %v3333_v45  ;;  %1451 = vmatpush1.bf16.msra.mxu1 %v3338_v46 }
 0x2cb   : > { %1411 = vmatprep.subr.bf16.mxu0 %v3343_v47  ;;  %1452 = vmatprep.subr.bf16.mxu1 %v3346_v48 }
 0x2ce   : > { %1412 = vmatpush1.bf16.msra.mxu0 %v3349_v49  ;;  %1453 = vmatpush1.bf16.msra.mxu1 %v3357_v51 }
 0x2cf   : > { %1413 = vmatprep.subr.bf16.mxu0 %v3354_v50  ;;  %1454 = vmatprep.subr.bf16.mxu1 %v3362_v52 }
 0x2d2   : > { %1414 = vmatpush1.bf16.msra.mxu0 %v3369_v54  ;;  %1455 = vmatpush1.bf16.msra.mxu1 %v3372_v55 }
 0x2d3   : > { %1415 = vmatprep.subr.bf16.mxu0 %v3377_v56  ;;  %1456 = vmatprep.subr.bf16.mxu1 %v3380_v57 }
 0x2d6   : > { %1416 = vmatpush1.bf16.msra.mxu0 %v3385_v58  ;;  %1457 = vmatpush1.bf16.msra.mxu1 %v3388_v59 }
 0x2d7   : > { %1417 = vmatprep.subr.bf16.mxu0 %v3393_v60  ;;  %1458 = vmatprep.subr.bf16.mxu1 %v3396_v61 }
 0x2da   : > { %1418 = vmatpush1.bf16.msra.mxu0 %v3403_v63  ;;  %1459 = vmatpush1.bf16.msra.mxu1 %v3406_v1 }
 0x2db   : > { %1419 = vmatprep.subr.bf16.mxu0 %v3411_v2  ;;  %1460 = vmatprep.subr.bf16.mxu1 %v3414_v3 }
 0x2de   : > { %1420 = vmatpush1.bf16.msra.mxu0 %v3419_v4  ;;  %1461 = vmatpush1.bf16.msra.mxu1 %v3422_v5 }
 0x2df   : > { %1522 = vmatprep.subr.bf16.mxu0 %v3295_v33  ;;  %1563 = vmatprep.subr.bf16.mxu1 %v3298_v34 }
 0x394   : > { %v1322_v53 = vpop.f32.mrb[24].mxu0  ;;  %v1363_v16 = vpop.f32.mrb[24].mxu1 }
 0x395   : > { %v1370_v6 = vadd.f32 %v1322_v53, %v1283_v25  ;;  %v1372_v17 = vadd.f32 %v1363_v16, %v1285_v62  ;;  %v1324_v8 = vpop.f32.mrb[25].mxu0  ;;  %v1365_v10 = vpop.f32.mrb[25].mxu1 }
 0x396   : > { %v1371_v11 = vadd.f32 %v1324_v8, %v1284_v7  ;;  %v1373_v12 = vadd.f32 %v1365_v10, %v1286_v9  ;;  %v1326_v13 = vpop.f32.mrb[26].mxu0  ;;  %v1367_v18 = vpop.f32.mrb[26].mxu1 }
 0x397   : > { %v1374_v19 = vmul.f32 0.5, %v1370_v6  ;;  %v1327_v33 = vpop.f32.mrb[27].mxu0  ;;  %v1368_v20 = vpop.f32.mrb[27].mxu1 }
 0x398   : > { %v1378_v34 = vmul.f32 0.5, %v1371_v11  ;;  %v1383_v21 = vmul.f32 0.5, %v1373_v12 }
 0x399   : > { %2662 = vtanh.f32 %v1374_v19 }
 0x39a   : > { %2664 = vtanh.f32 %v1378_v34 }
 0x39b   : > { %2666 = vtanh.f32 %v1372_v17 }
 0x39c   : > { %2668 = vtanh.f32 %v1383_v21 }
 0x3a3   : > { %v2663_v22 = vpop.eup %2662 }
 0x3a4   : > { %v2665_v23 = vpop.eup %2664  ;;  %v1376_v24 = vmul.f32 0.5, %v2663_v22  ;;  %v3684_v22 = vld [vmem:[%s3286_s9] ss:$16 sps:$4 sm:$0xff]  }
 0x3a5   : > { %v1380_v26 = vmul.f32 0.5, %v2665_v23  ;;  %v2667_v28 = vpop.eup %2666  ;;  %v3688_v23 = vld [vmem:[%s3286_s9 + $0x8] ss:$16 sps:$4 sm:$0xff]  }
 0x3a6   : > { %v1377_v27 = vadd.f32 0.5, %v1376_v24  ;;  %v2669_v15 = vpop.eup %2668  ;;  %v3692_v24 = vld [vmem:[%s3286_s9 + $0x24] ss:$16 sps:$4 sm:$0xff]  }
 0x3a7   : > { %v1381_v29 = vadd.f32 0.5, %v1380_v26  ;;  %v1385_v35 = vmul.f32 0.5, %v2669_v15  ;;  %v3696_v26 = vld [vmem:[%s3286_s9 + $0x2c] ss:$16 sps:$4 sm:$0xff]   ;;  %v3726_v15 = vld [vmem:[%s3286_s9 + $0x64] ss:$16 sps:$4 sm:$0xff]  }
 0x3a8   : > { %v1388_v31 = vmul.f32 %v2667_v28, %v1377_v27  ;;  %v3702_v27 = vld [vmem:[%s3286_s9 + $0x20] ss:$16 sps:$4 sm:$0xff]   ;;  %v3706_v28 = vld [vmem:[%s3286_s9 + $0x28] ss:$16 sps:$4 sm:$0xff]  }
 0x3a9   : > { %v1387_v14 = vmul.f32 %v1381_v29, %v3590_v30  ;;  %v1386_v44 = vadd.f32 0.5, %v1385_v35  ;;  %v3710_v29 = vld [vmem:[%s3286_s9 + $0x44] ss:$16 sps:$4 sm:$0xff]   ;;  %v3730_v35 = vld [vmem:[%s3286_s9 + $0x6c] ss:$16 sps:$4 sm:$0xff]  }
 0x3ab   : > { %v3631_v32 = vadd.f32 %v1388_v31, %v1387_v14  ;;  %v3714_v31 = vld [vmem:[%s3286_s9 + $0x4c] ss:$16 sps:$4 sm:$0xff]   ;;  %v3718_v14 = vld [vmem:[%s3286_s9 + $0x40] ss:$16 sps:$4 sm:$0xff]  }
 0x3ad   : > { %2670 = vtanh.f32 %v3631_v32 }
 0x3b7   : > { %v2671_v25 = vpop.eup %2670 }
 0x3b8   : > { %v1391_v53 = vmul.f32 %v2671_v25, %v1386_v44  ;;  %v3734_v44 = vld [vmem:[%s3286_s9 + $0x60] ss:$16 sps:$4 sm:$0xff]   ;;  %v3738_v25 = vld [vmem:[%s3286_s9 + $0x68] ss:$16 sps:$4 sm:$0xff]  }
 0x3ba   : > { %1394 = vst [vmem:[%s1393_s25] sm:$0xff] %v1391_v53  ;;  %v1404_v62 = vpack.c.bf16 %v1391_v53, %v1391_v53  ;;  %v3742_v53 = vld [vmem:[%s3286_s9 + $0x84] ss:$16 sps:$4 sm:$0xff]   ;;  %s2423_s25 = sshll.u32 %s3479_s19, 3 }
 0x3bb   : > { %s1861_s17 = scalar_lea.vmem %s3547_s7, %s2423_s25 [#allocation9] }
 0x3bc   : > { %1438 = vmatmul.mubr.bf16.vlgmr.msra.gmra.mrb[28].mxu0 %v1404_v62  ;;  %1479 = vmatmul.mubr.bf16.vlgmr.msra.gmra.mrb[28].mxu1 %v1404_v62  ;;  %v3746_v62 = vld [vmem:[%s3286_s9 + $0x8c] ss:$16 sps:$4 sm:$0xff]  }
 0x3bd   : > { %1523 = vmatpush1.bf16.msra.mxu0 %v3301_v36  ;;  %1564 = vmatpush1.bf16.msra.mxu1 %v3304_v37  ;;  %v3669_v36 = vld [vmem:[%s3286_s9 + $0x4] ss:$16 sps:$4 sm:$0xff]   ;;  %v3673_v37 = vld [vmem:[%s3286_s9 + $0xc] ss:$16 sps:$4 sm:$0xff]  }
 0x3be   : > { %1524 = vmatprep.subr.bf16.mxu0 %v3309_v38  ;;  %1565 = vmatprep.subr.bf16.mxu1 %v3312_v39  ;;  %v1400_v38 = vld [vmem:[%s1399_s18] sm:$0xff] }
 0x3bf   : > { %1554 = vmatprep.mubr.bf16.mxu0 %v2997_v0  ;;  %1595 = vmatprep.mubr.bf16.mxu1 %v2997_v0 }
 0x3c1   : > { %1525 = vmatpush1.bf16.msra.mxu0 %v3315_v40  ;;  %1566 = vmatpush1.bf16.msra.mxu1 %v3323_v42  ;;  %v1402_v40 = vld [vmem:[%s1399_s18 + $0x10] sm:$0xff] }
 0x3c2   : > { %1526 = vmatprep.subr.bf16.mxu0 %v3318_v41  ;;  %1567 = vmatprep.subr.bf16.mxu1 %v3328_v43 }
 0x3c5   : > { %1527 = vmatpush1.bf16.msra.mxu0 %v3333_v45  ;;  %1568 = vmatpush1.bf16.msra.mxu1 %v3338_v46  ;;  %v1401_v45 = vld [vmem:[%s1399_s18 + $0x8] sm:$0xff] }
 0x3c6   : > { %1528 = vmatprep.subr.bf16.mxu0 %v3343_v47  ;;  %1569 = vmatprep.subr.bf16.mxu1 %v3346_v48  ;;  %v1403_v47 = vld [vmem:[%s1399_s18 + $0x18] sm:$0xff]  ;;  %s2445_s18 = sshll.u32 %s3482_s15, 5  ;;  %s3907_s15 = scalar_lea.hbm %s4020_s5, %s2431_s20 }
 0x3c7   : > { %s1867_s14 = scalar_lea.vmem [#allocation2], %s2445_s18  ;;  %s3914_s18 = scalar_lea.hbm %s4021_s6, %s2431_s20 }
 0x3c9   : > { %1529 = vmatpush1.bf16.msra.mxu0 %v3349_v49  ;;  %1570 = vmatpush1.bf16.msra.mxu1 %v3357_v51 }
 0x3ca   : > { %1530 = vmatprep.subr.bf16.mxu0 %v3354_v50  ;;  %1571 = vmatprep.subr.bf16.mxu1 %v3362_v52 }
 0x3cd   : > { %1531 = vmatpush1.bf16.msra.mxu0 %v3369_v54  ;;  %1572 = vmatpush1.bf16.msra.mxu1 %v3372_v55 }
 0x3ce   : > { %1532 = vmatprep.subr.bf16.mxu0 %v3377_v56  ;;  %1573 = vmatprep.subr.bf16.mxu1 %v3380_v57 }
 0x3d1   : > { %1533 = vmatpush1.bf16.msra.mxu0 %v3385_v58  ;;  %1574 = vmatpush1.bf16.msra.mxu1 %v3388_v59 }
 0x3d2   : > { %1534 = vmatprep.subr.bf16.mxu0 %v3393_v60  ;;  %1575 = vmatprep.subr.bf16.mxu1 %v3396_v61 }
 0x3d5   : > { %1535 = vmatpush1.bf16.msra.mxu0 %v3403_v63  ;;  %1576 = vmatpush1.bf16.msra.mxu1 %v3406_v1 }
 0x3d6   : > { %1536 = vmatprep.subr.bf16.mxu0 %v3411_v2  ;;  %1577 = vmatprep.subr.bf16.mxu1 %v3414_v3 }
 0x3d9   : > { %1537 = vmatpush1.bf16.msra.mxu0 %v3419_v4  ;;  %1578 = vmatpush1.bf16.msra.mxu1 %v3422_v5 }
 0x3da   : > { %1639 = vmatprep.subr.bf16.mxu0 %v3669_v36  ;;  %1680 = vmatprep.subr.bf16.mxu1 %v3673_v37 }
 0x48f   : > { %v1439_v39 = vpop.f32.mrb[28].mxu0  ;;  %v1480_v41 = vpop.f32.mrb[28].mxu1 }
 0x490   : > { %v1487_v42 = vadd.f32 %v1439_v39, %v1400_v38  ;;  %v1489_v43 = vadd.f32 %v1480_v41, %v1402_v40  ;;  %v1441_v46 = vpop.f32.mrb[29].mxu0  ;;  %v1482_v48 = vpop.f32.mrb[29].mxu1  ;;  %v3750_v38 = vld [vmem:[%s3286_s9 + $0x80] ss:$16 sps:$4 sm:$0xff]   ;;  %v3754_v39 = vld [vmem:[%s3286_s9 + $0x88] ss:$16 sps:$4 sm:$0xff]  }
 0x491   : > { %v1488_v49 = vadd.f32 %v1441_v46, %v1401_v45  ;;  %v1490_v50 = vadd.f32 %v1482_v48, %v1403_v47  ;;  %v1443_v51 = vpop.f32.mrb[30].mxu0  ;;  %v1484_v52 = vpop.f32.mrb[30].mxu1  ;;  %v3758_v40 = vld [vmem:[%s3286_s9 + $0xa4] ss:$16 sps:$4 sm:$0xff]   ;;  %v3762_v41 = vld [vmem:[%s3286_s9 + $0xac] ss:$16 sps:$4 sm:$0xff]  }
 0x492   : > { %v1491_v54 = vmul.f32 0.5, %v1487_v42  ;;  %v1444_v55 = vpop.f32.mrb[31].mxu0  ;;  %v1485_v56 = vpop.f32.mrb[31].mxu1  ;;  %v1518_v42 = vld [vmem:[%s1516_s28 + $0x8] sm:$0xff] }
 0x493   : > { %v1495_v57 = vmul.f32 0.5, %v1488_v49  ;;  %v1500_v30 = vmul.f32 0.5, %v1490_v50 }
 0x494   : > { %2672 = vtanh.f32 %v1491_v54 }
 0x495   : > { %2674 = vtanh.f32 %v1495_v57 }
 0x496   : > { %2676 = vtanh.f32 %v1489_v43  ;;  %v1520_v43 = vld [vmem:[%s1516_s28 + $0x18] sm:$0xff] }
 0x497   : > { %2678 = vtanh.f32 %v1500_v30 }
 0x49e   : > { %v2673_v16 = vpop.eup %2672 }
 0x49f   : > { %v2675_v6 = vpop.eup %2674  ;;  %v1493_v17 = vmul.f32 0.5, %v2673_v16 }
 0x4a0   : > { %v1497_v7 = vmul.f32 0.5, %v2675_v6  ;;  %v2677_v9 = vpop.eup %2676 }
 0x4a1   : > { %v1494_v8 = vadd.f32 0.5, %v1493_v17  ;;  %v2679_v18 = vpop.eup %2678 }
 0x4a2   : > { %v1498_v10 = vadd.f32 0.5, %v1497_v7  ;;  %v1502_v19 = vmul.f32 0.5, %v2679_v18 }
 0x4a3   : > { %v1505_v11 = vmul.f32 %v2677_v9, %v1494_v8 }
 0x4a4   : > { %v1504_v12 = vmul.f32 %v1498_v10, %v3631_v32  ;;  %v1503_v33 = vadd.f32 0.5, %v1502_v19  ;;  %v3722_v32 = vld [vmem:[%s3286_s9 + $0x48] ss:$16 sps:$4 sm:$0xff]  }
 0x4a5   : > { %v3811_v19 = vld [vmem:[%s3286_s9 + $0xa8] ss:$16 sps:$4 sm:$0xff]  }
 0x4a6   : > { %v3678_v13 = vadd.f32 %v1505_v11, %v1504_v12 }
 0x4a8   : > { %2680 = vtanh.f32 %v3678_v13 }
 0x4b2   : > { %v2681_v20 = vpop.eup %2680 }
 0x4b3   : > { %v1508_v34 = vmul.f32 %v2681_v20, %v1503_v33  ;;  %v3815_v33 = vld [vmem:[%s3286_s9 + $0xc4] ss:$16 sps:$4 sm:$0xff]   ;;  %v3819_v20 = vld [vmem:[%s3286_s9 + $0xcc] ss:$16 sps:$4 sm:$0xff]  }
 0x4b5   : > { %1511 = vst [vmem:[%s1510_s16] sm:$0xff] %v1508_v34  ;;  %v1521_v21 = vpack.c.bf16 %v1508_v34, %v1508_v34  ;;  %v3823_v34 = vld [vmem:[%s3286_s9 + $0xc0] ss:$16 sps:$4 sm:$0xff]  }
 0x4b7   : > { %1555 = vmatmul.mubr.bf16.vlgmr.msra.gmra.mrb[32].mxu0 %v1521_v21  ;;  %1596 = vmatmul.mubr.bf16.vlgmr.msra.gmra.mrb[32].mxu1 %v1521_v21  ;;  %v3827_v21 = vld [vmem:[%s3286_s9 + $0xc8] ss:$16 sps:$4 sm:$0xff]  }
 0x4b8   : > { %1640 = vmatpush1.bf16.msra.mxu0 %v3684_v22  ;;  %1681 = vmatpush1.bf16.msra.mxu1 %v3688_v23 }
 0x4b9   : > { %1641 = vmatprep.subr.bf16.mxu0 %v3692_v24  ;;  %1682 = vmatprep.subr.bf16.mxu1 %v3696_v26 }
 0x4ba   : > { %1671 = vmatprep.mubr.bf16.mxu0 %v2997_v0  ;;  %1712 = vmatprep.mubr.bf16.mxu1 %v2997_v0 }
 0x4bc   : > { %1642 = vmatpush1.bf16.msra.mxu0 %v3702_v27  ;;  %1683 = vmatpush1.bf16.msra.mxu1 %v3706_v28 }
 0x4bd   : > { %1643 = vmatprep.subr.bf16.mxu0 %v3710_v29  ;;  %1684 = vmatprep.subr.bf16.mxu1 %v3714_v31 }
 0x4c0   : > { %1644 = vmatpush1.bf16.msra.mxu0 %v3718_v14  ;;  %1685 = vmatpush1.bf16.msra.mxu1 %v3722_v32 }
 0x4c1   : > { %1645 = vmatprep.subr.bf16.mxu0 %v3726_v15  ;;  %1686 = vmatprep.subr.bf16.mxu1 %v3730_v35 }
 0x4c4   : > { %1646 = vmatpush1.bf16.msra.mxu0 %v3734_v44  ;;  %1687 = vmatpush1.bf16.msra.mxu1 %v3738_v25 }
 0x4c5   : > { %1647 = vmatprep.subr.bf16.mxu0 %v3742_v53  ;;  %1688 = vmatprep.subr.bf16.mxu1 %v3746_v62 }
 0x4c8   : > { %1648 = vmatpush1.bf16.msra.mxu0 %v3750_v38  ;;  %1689 = vmatpush1.bf16.msra.mxu1 %v3754_v39 }
 0x4c9   : > { %1649 = vmatprep.subr.bf16.mxu0 %v3758_v40  ;;  %1690 = vmatprep.subr.bf16.mxu1 %v3762_v41 }
 0x4cc   : > { %1650 = vmatpush1.bf16.msra.mxu0 %v3385_v58  ;;  %1691 = vmatpush1.bf16.msra.mxu1 %v3388_v59  ;;  %v1517_v58 = vld [vmem:[%s1516_s28] sm:$0xff] }
 0x4cd   : > { %1651 = vmatprep.subr.bf16.mxu0 %v3393_v60  ;;  %1692 = vmatprep.subr.bf16.mxu1 %v3396_v61  ;;  %v1519_v60 = vld [vmem:[%s1516_s28 + $0x10] sm:$0xff]  ;;  %s2011_s28 = sshll.u32 %s3547_s7, 4  ;;  %s3897_s28 = int_to_ptr.vmem [resolvable:$true] %s2011_s28 }
 0x4d0   : > { %1652 = vmatpush1.bf16.msra.mxu0 %v3403_v63  ;;  %1693 = vmatpush1.bf16.msra.mxu1 %v3406_v1 }
 0x4d1   : > { %1653 = vmatprep.subr.bf16.mxu0 %v3411_v2  ;;  %1694 = vmatprep.subr.bf16.mxu1 %v3414_v3 }
 0x4d4   : > { %1654 = vmatpush1.bf16.msra.mxu0 %v3419_v4  ;;  %1695 = vmatpush1.bf16.msra.mxu1 %v3422_v5 }
 0x4d5   : > { %1756 = vmatprep.subr.bf16.mxu0 %v3669_v36  ;;  %1797 = vmatprep.subr.bf16.mxu1 %v3673_v37 }
 0x58a   : > { %v1556_v59 = vpop.f32.mrb[32].mxu0  ;;  %v1597_v61 = vpop.f32.mrb[32].mxu1 }
 0x58b   : > { %v1604_v63 = vadd.f32 %v1556_v59, %v1517_v58  ;;  %v1606_v1 = vadd.f32 %v1597_v61, %v1519_v60  ;;  %v1558_v2 = vpop.f32.mrb[33].mxu0  ;;  %v1599_v3 = vpop.f32.mrb[33].mxu1  ;;  %v3831_v58 = vld [vmem:[%s3286_s9 + $0xe4] ss:$16 sps:$4 sm:$0xff]   ;;  %v3835_v59 = vld [vmem:[%s3286_s9 + $0xec] ss:$16 sps:$4 sm:$0xff]  }
 0x58c   : > { %v1605_v45 = vadd.f32 %v1558_v2, %v1518_v42  ;;  %v1607_v4 = vadd.f32 %v1599_v3, %v1520_v43  ;;  %v1560_v46 = vpop.f32.mrb[34].mxu0  ;;  %v1601_v5 = vpop.f32.mrb[34].mxu1  ;;  %v3839_v60 = vld [vmem:[%s3286_s9 + $0xe0] ss:$16 sps:$4 sm:$0xff]   ;;  %v3843_v61 = vld [vmem:[%s3286_s9 + $0xe8] ss:$16 sps:$4 sm:$0xff]  }
 0x58d   : > { %v1608_v47 = vmul.f32 0.5, %v1604_v63  ;;  %v1561_v48 = vpop.f32.mrb[35].mxu0  ;;  %v1602_v49 = vpop.f32.mrb[35].mxu1  ;;  %v1634_v63 = vld [vmem:[%s1633_s0] sm:$0xff]  ;;  %v1636_v42 = vld [vmem:[%s1633_s0 + $0x10] sm:$0xff]  ;;  %v1637_v46 = vld [vmem:[%s1633_s0 + $0x18] sm:$0xff] }
 0x58e   : > { %v1612_v50 = vmul.f32 0.5, %v1605_v45  ;;  %v1617_v51 = vmul.f32 0.5, %v1607_v4  ;;  %v1635_v45 = vld [vmem:[%s1633_s0 + $0x8] sm:$0xff] }
 0x58f   : > { %2682 = vtanh.f32 %v1608_v47 }
 0x590   : > { %2684 = vtanh.f32 %v1612_v50 }
 0x591   : > { %2686 = vtanh.f32 %v1606_v1 }
 0x592   : > { %2688 = vtanh.f32 %v1617_v51 }
 0x599   : > { %v2683_v52 = vpop.eup %2682 }
 0x59a   : > { %v2685_v54 = vpop.eup %2684  ;;  %v1610_v55 = vmul.f32 0.5, %v2683_v52 }
 0x59b   : > { %v1614_v56 = vmul.f32 0.5, %v2685_v54  ;;  %v2687_v30 = vpop.eup %2686 }
 0x59c   : > { %v1611_v57 = vadd.f32 0.5, %v1610_v55  ;;  %v2689_v8 = vpop.eup %2688 }
 0x59d   : > { %v1615_v16 = vadd.f32 0.5, %v1614_v56  ;;  %v1619_v9 = vmul.f32 0.5, %v2689_v8 }
 0x59e   : > { %v1622_v6 = vmul.f32 %v2687_v30, %v1611_v57 }
 0x59f   : > { %v1621_v17 = vmul.f32 %v1615_v16, %v3678_v13  ;;  %v1620_v10 = vadd.f32 0.5, %v1619_v9  ;;  %v3807_v13 = vld [vmem:[%s3286_s9 + $0xa0] ss:$16 sps:$4 sm:$0xff]   ;;  %s2420_s9 = sshll.u32 %s3475_s30, 3  ;;  %s2444_s30 = sshll.u32 %s3479_s19, 5 }
 0x5a0   : > { %s1744_s8 = scalar_lea.vmem %s3547_s7, %s2420_s9 [#allocation9]  ;;  %s1750_s23 = scalar_lea.vmem [#allocation2], %s2444_s30 }
 0x5a1   : > { %v3779_v7 = vadd.f32 %v1622_v6, %v1621_v17  ;;  %s2329_s19 = sshll.u32 %s3243_s13, 3  ;;  %s3902_s30 = scalar_lea.hbm %s4019_s4, %s2431_s20 }
 0x5a2   : > { %s406_s16 = scalar_lea.vmem [#allocation12], %s2329_s19  ;;  %s399_s29 = scalar_lea.vmem [#allocation10], %s2329_s19 }
 0x5a3   : > { %2690 = vtanh.f32 %v3779_v7  ;;  %s2027_s0 = sshll.u32 %s399_s29, 4  ;;  %s2040_s24 = sshll.u32 %s406_s16, 4  ;;  %s3909_s0 = int_to_ptr.vmem [resolvable:$true] %s2027_s0  ;;  %s3916_s24 = int_to_ptr.vmem [resolvable:$true] %s2040_s24 }
 0x5ad   : > { %v2691_v11 = vpop.eup %2690 }
 0x5ae   : > { %v1625_v12 = vmul.f32 %v2691_v11, %v1620_v10 }
 0x5b0   : > { %1628 = vst [vmem:[%s1627_s11] sm:$0xff] %v1625_v12  ;;  %v1638_v18 = vpack.c.bf16 %v1625_v12, %v1625_v12  ;;  %s1978_s11 = scalar_lea.vmem %s3547_s7, %s2426_s1 [#allocation9]  ;;  %s2842_s1 = scalar_lea.vmem %s3909_s0, 128 }
 0x5b1   : > { %p2843_p9 = scmp.ne.s32.totalorder %s3909_s0, %s2842_s1 }
 0x5b2   : > { %1672 = vmatmul.mubr.bf16.vlgmr.msra.gmra.mrb[36].mxu0 %v1638_v18  ;;  %1713 = vmatmul.mubr.bf16.vlgmr.msra.gmra.mrb[36].mxu1 %v1638_v18 }
 0x5b3   : > { %1757 = vmatpush1.bf16.msra.mxu0 %v3684_v22  ;;  %1798 = vmatpush1.bf16.msra.mxu1 %v3688_v23  ;;  %p2844_p12 = pnand %p2843_p9, %p4066_p7 }
 0x5b4   : > { %1758 = vmatprep.subr.bf16.mxu0 %v3692_v24  ;;  %1799 = vmatprep.subr.bf16.mxu1 %v3696_v26 }
 0x5b5   : > { %1788 = vmatprep.mubr.bf16.mxu0 %v2997_v0  ;;  %1829 = vmatprep.mubr.bf16.mxu1 %v2997_v0  ;;  %p2845_p13 = pneg %p2844_p12 }
 0x5b7   : > { %1759 = vmatpush1.bf16.msra.mxu0 %v3702_v27  ;;  %1800 = vmatpush1.bf16.msra.mxu1 %v3706_v28 }
 0x5b8   : > { %1760 = vmatprep.subr.bf16.mxu0 %v3710_v29  ;;  %1801 = vmatprep.subr.bf16.mxu1 %v3714_v31 }
 0x5bb   : > { %1761 = vmatpush1.bf16.msra.mxu0 %v3718_v14  ;;  %1802 = vmatpush1.bf16.msra.mxu1 %v3722_v32 }
 0x5bc   : > { %1762 = vmatprep.subr.bf16.mxu0 %v3726_v15  ;;  %1803 = vmatprep.subr.bf16.mxu1 %v3730_v35 }
 0x5bf   : > { %1763 = vmatpush1.bf16.msra.mxu0 %v3734_v44  ;;  %1804 = vmatpush1.bf16.msra.mxu1 %v3738_v25 }
 0x5c0   : > { %1764 = vmatprep.subr.bf16.mxu0 %v3742_v53  ;;  %1805 = vmatprep.subr.bf16.mxu1 %v3746_v62 }
 0x5c3   : > { %1765 = vmatpush1.bf16.msra.mxu0 %v3750_v38  ;;  %1806 = vmatpush1.bf16.msra.mxu1 %v3754_v39 }
 0x5c4   : > { %1766 = vmatprep.subr.bf16.mxu0 %v3758_v40  ;;  %1807 = vmatprep.subr.bf16.mxu1 %v3762_v41 }
 0x5c7   : > { %1767 = vmatpush1.bf16.msra.mxu0 %v3807_v13  ;;  %1808 = vmatpush1.bf16.msra.mxu1 %v3811_v19 }
 0x5c8   : > { %1768 = vmatprep.subr.bf16.mxu0 %v3815_v33  ;;  %1809 = vmatprep.subr.bf16.mxu1 %v3819_v20 }
 0x5cb   : > { %1769 = vmatpush1.bf16.msra.mxu0 %v3823_v34  ;;  %1810 = vmatpush1.bf16.msra.mxu1 %v3827_v21 }
 0x5cc   : > { %1770 = vmatprep.subr.bf16.mxu0 %v3831_v58  ;;  %1811 = vmatprep.subr.bf16.mxu1 %v3835_v59 }
 0x5cf   : > { %1771 = vmatpush1.bf16.msra.mxu0 %v3839_v60  ;;  %1812 = vmatpush1.bf16.msra.mxu1 %v3843_v61 }
 0x5d0   : > { %1873 = vmatprep.subr.bf16.mxu0 %v3669_v36  ;;  %1914 = vmatprep.subr.bf16.mxu1 %v3673_v37 }
 0x685   : > { %v1673_v1 = vpop.f32.mrb[36].mxu0  ;;  %v1714_v2 = vpop.f32.mrb[36].mxu1 }
 0x686   : > { %v1721_v43 = vadd.f32 %v1673_v1, %v1634_v63  ;;  %v1723_v3 = vadd.f32 %v1714_v2, %v1636_v42  ;;  %v1675_v4 = vpop.f32.mrb[37].mxu0  ;;  %v1716_v5 = vpop.f32.mrb[37].mxu1 }
 0x687   : > { %v1722_v47 = vadd.f32 %v1675_v4, %v1635_v45  ;;  %v1724_v48 = vadd.f32 %v1716_v5, %v1637_v46  ;;  %v1677_v49 = vpop.f32.mrb[38].mxu0  ;;  %v1718_v50 = vpop.f32.mrb[38].mxu1  ;;  %v1868_v45 = vld [vmem:[%s1867_s14] sm:$0xff]  ;;  %v1870_v46 = vld [vmem:[%s1867_s14 + $0x10] sm:$0xff] }
 0x688   : > { %v1725_v51 = vmul.f32 0.5, %v1721_v43  ;;  %v1678_v36 = vpop.f32.mrb[39].mxu0  ;;  %v1719_v52 = vpop.f32.mrb[39].mxu1  ;;  %v1869_v49 = vld [vmem:[%s1867_s14 + $0x8] sm:$0xff] }
 0x689   : > { %v1729_v37 = vmul.f32 0.5, %v1722_v47  ;;  %v1734_v54 = vmul.f32 0.5, %v1724_v48 }
 0x68a   : > { %2692 = vtanh.f32 %v1725_v51  ;;  %v1871_v51 = vld [vmem:[%s1867_s14 + $0x18] sm:$0xff]  ;;  %s4065_s14 = sand.u32 1, %s3071_s27  }
 0x68b   : > { %2694 = vtanh.f32 %v1729_v37  ;;  %s3920_s19 = scalar_lea.sflag [#allocation11], %s4065_s14 }
 0x68c   : > { %2696 = vtanh.f32 %v1723_v3 }
 0x68d   : > { %2698 = vtanh.f32 %v1734_v54 }
 0x694   : > { %v2693_v55 = vpop.eup %2692 }
 0x695   : > { %v2695_v56 = vpop.eup %2694  ;;  %v1727_v57 = vmul.f32 0.5, %v2693_v55 }
 0x696   : > { %v1731_v30 = vmul.f32 0.5, %v2695_v56  ;;  %v2697_v6 = vpop.eup %2696 }
 0x697   : > { %v1728_v16 = vadd.f32 0.5, %v1727_v57  ;;  %v2699_v11 = vpop.eup %2698 }
 0x698   : > { %v1732_v17 = vadd.f32 0.5, %v1731_v30  ;;  %v1736_v12 = vmul.f32 0.5, %v2699_v11 }
 0x699   : > { %v1739_v8 = vmul.f32 %v2697_v6, %v1728_v16 }
 0x69a   : > { %v1738_v9 = vmul.f32 %v1732_v17, %v3779_v7  ;;  %v1737_v18 = vadd.f32 0.5, %v1736_v12 }
 0x69c   : > { %v3850_v10 = vadd.f32 %v1739_v8, %v1738_v9 }
 0x69e   : > { %2700 = vtanh.f32 %v3850_v10 }
 0x6a8   : > { %v2701_v63 = vpop.eup %2700 }
 0x6a9   : > { %v1742_v1 = vmul.f32 %v2701_v63, %v1737_v18 }
 0x6ab   : > { %1745 = vst [vmem:[%s1744_s8] sm:$0xff] %v1742_v1  ;;  %v1755_v42 = vpack.c.bf16 %v1742_v1, %v1742_v1 }
 0x6ad   : > { %1789 = vmatmul.mubr.bf16.vlgmr.msra.gmra.mrb[40].mxu0 %v1755_v42  ;;  %1830 = vmatmul.mubr.bf16.vlgmr.msra.gmra.mrb[40].mxu1 %v1755_v42 }
 0x6ae   : > { %1874 = vmatpush1.bf16.msra.mxu0 %v3684_v22  ;;  %1915 = vmatpush1.bf16.msra.mxu1 %v3688_v23  ;;  %v1753_v23 = vld [vmem:[%s1750_s23 + $0x10] sm:$0xff] }
 0x6af   : > { %1875 = vmatprep.subr.bf16.mxu0 %v3692_v24  ;;  %1916 = vmatprep.subr.bf16.mxu1 %v3696_v26 }
 0x6b0   : > { %1905 = vmatprep.mubr.bf16.mxu0 %v2997_v0  ;;  %1946 = vmatprep.mubr.bf16.mxu1 %v2997_v0  ;;  %v1751_v0 = vld [vmem:[%s1750_s23] sm:$0xff] }
 0x6b2   : > { %1876 = vmatpush1.bf16.msra.mxu0 %v3702_v27  ;;  %1917 = vmatpush1.bf16.msra.mxu1 %v3706_v28  ;;  %v1752_v28 = vld [vmem:[%s1750_s23 + $0x8] sm:$0xff] }
 0x6b3   : > { %1877 = vmatprep.subr.bf16.mxu0 %v3710_v29  ;;  %1918 = vmatprep.subr.bf16.mxu1 %v3714_v31  ;;  %v1754_v31 = vld [vmem:[%s1750_s23 + $0x18] sm:$0xff] }
 0x6b6   : > { %1878 = vmatpush1.bf16.msra.mxu0 %v3718_v14  ;;  %1919 = vmatpush1.bf16.msra.mxu1 %v3722_v32 }
 0x6b7   : > { %1879 = vmatprep.subr.bf16.mxu0 %v3726_v15  ;;  %1920 = vmatprep.subr.bf16.mxu1 %v3730_v35 }
 0x6ba   : > { %1880 = vmatpush1.bf16.msra.mxu0 %v3734_v44  ;;  %1921 = vmatpush1.bf16.msra.mxu1 %v3738_v25 }
 0x6bb   : > { %1881 = vmatprep.subr.bf16.mxu0 %v3742_v53  ;;  %1922 = vmatprep.subr.bf16.mxu1 %v3746_v62 }
 0x6be   : > { %1882 = vmatpush1.bf16.msra.mxu0 %v3750_v38  ;;  %1923 = vmatpush1.bf16.msra.mxu1 %v3754_v39 }
 0x6bf   : > { %1883 = vmatprep.subr.bf16.mxu0 %v3758_v40  ;;  %1924 = vmatprep.subr.bf16.mxu1 %v3762_v41 }
 0x6c2   : > { %1884 = vmatpush1.bf16.msra.mxu0 %v3807_v13  ;;  %1925 = vmatpush1.bf16.msra.mxu1 %v3811_v19 }
 0x6c3   : > { %1885 = vmatprep.subr.bf16.mxu0 %v3815_v33  ;;  %1926 = vmatprep.subr.bf16.mxu1 %v3819_v20 }
 0x6c6   : > { %1886 = vmatpush1.bf16.msra.mxu0 %v3823_v34  ;;  %1927 = vmatpush1.bf16.msra.mxu1 %v3827_v21 }
 0x6c7   : > { %1887 = vmatprep.subr.bf16.mxu0 %v3831_v58  ;;  %1928 = vmatprep.subr.bf16.mxu1 %v3835_v59 }
 0x6ca   : > { %1888 = vmatpush1.bf16.msra.mxu0 %v3839_v60  ;;  %1929 = vmatpush1.bf16.msra.mxu1 %v3843_v61 }
 0x780   : > { %v1790_v22 = vpop.f32.mrb[40].mxu0  ;;  %v1831_v24 = vpop.f32.mrb[40].mxu1 }
 0x781   : > { %v1838_v26 = vadd.f32 %v1790_v22, %v1751_v0  ;;  %v1840_v27 = vadd.f32 %v1831_v24, %v1753_v23  ;;  %v1792_v29 = vpop.f32.mrb[41].mxu0  ;;  %v1833_v14 = vpop.f32.mrb[41].mxu1 }
 0x782   : > { %v1839_v32 = vadd.f32 %v1792_v29, %v1752_v28  ;;  %v1841_v15 = vadd.f32 %v1833_v14, %v1754_v31  ;;  %v1794_v35 = vpop.f32.mrb[42].mxu0  ;;  %v1835_v44 = vpop.f32.mrb[42].mxu1 }
 0x783   : > { %v1842_v25 = vmul.f32 0.5, %v1838_v26  ;;  %v1795_v53 = vpop.f32.mrb[43].mxu0  ;;  %v1836_v62 = vpop.f32.mrb[43].mxu1 }
 0x784   : > { %v1846_v38 = vmul.f32 0.5, %v1839_v32  ;;  %v1851_v39 = vmul.f32 0.5, %v1841_v15 }
 0x785   : > { %2702 = vtanh.f32 %v1842_v25 }
 0x786   : > { %2704 = vtanh.f32 %v1846_v38 }
 0x787   : > { %2706 = vtanh.f32 %v1840_v27 }
 0x788   : > { %2708 = vtanh.f32 %v1851_v39 }
 0x78f   : > { %v2703_v40 = vpop.eup %2702 }
 0x790   : > { %v2705_v41 = vpop.eup %2704  ;;  %v1844_v7 = vmul.f32 0.5, %v2703_v40 }
 0x791   : > { %v1848_v13 = vmul.f32 0.5, %v2705_v41  ;;  %v2707_v33 = vpop.eup %2706 }
 0x792   : > { %v1845_v19 = vadd.f32 0.5, %v1844_v7  ;;  %v2709_v59 = vpop.eup %2708 }
 0x793   : > { %v1849_v20 = vadd.f32 0.5, %v1848_v13  ;;  %v1853_v60 = vmul.f32 0.5, %v2709_v59 }
 0x794   : > { %v1856_v34 = vmul.f32 %v2707_v33, %v1845_v19 }
 0x795   : > { %v1855_v21 = vmul.f32 %v1849_v20, %v3850_v10  ;;  %v1854_v61 = vadd.f32 0.5, %v1853_v60 }
 0x797   : > { %v1857_v58 = vadd.f32 %v1856_v34, %v1855_v21 }
 0x799   : > { %2710 = vtanh.f32 %v1857_v58 }
 0x7a3   : > { %v2711_v2 = vpop.eup %2710 }
 0x7a4   : > { %v1859_v43 = vmul.f32 %v2711_v2, %v1854_v61 }
 0x7a6   : > { %1862 = vst [vmem:[%s1861_s17] sm:$0xff] %v1859_v43  ;;  %v1872_v3 = vpack.c.bf16 %v1859_v43, %v1859_v43 }
 0x7a8   : > { %1906 = vmatmul.mubr.bf16.vlgmr.msra.gmra.mrb[44].mxu0 %v1872_v3  ;;  %1947 = vmatmul.mubr.bf16.vlgmr.msra.gmra.mrb[44].mxu1 %v1872_v3 }
 0x87b   : > { %v1907_v4 = vpop.f32.mrb[44].mxu0  ;;  %v1948_v5 = vpop.f32.mrb[44].mxu1 }
 0x87c   : > { %v1955_v47 = vadd.f32 %v1907_v4, %v1868_v45  ;;  %v1957_v48 = vadd.f32 %v1948_v5, %v1870_v46  ;;  %v1909_v50 = vpop.f32.mrb[45].mxu0  ;;  %v1950_v36 = vpop.f32.mrb[45].mxu1 }
 0x87d   : > { %v1956_v52 = vadd.f32 %v1909_v50, %v1869_v49  ;;  %v1958_v37 = vadd.f32 %v1950_v36, %v1871_v51  ;;  %v1911_v54 = vpop.f32.mrb[46].mxu0  ;;  %v1952_v55 = vpop.f32.mrb[46].mxu1 }
 0x87e   : > { %v1959_v56 = vmul.f32 0.5, %v1955_v47  ;;  %v1912_v57 = vpop.f32.mrb[47].mxu0  ;;  %v1953_v30 = vpop.f32.mrb[47].mxu1 }
 0x87f   : > { %v1963_v16 = vmul.f32 0.5, %v1956_v52  ;;  %v1968_v6 = vmul.f32 0.5, %v1958_v37 }
 0x880   : > { %2712 = vtanh.f32 %v1959_v56 }
 0x881   : > { %2714 = vtanh.f32 %v1963_v16 }
 0x882   : > { %2716 = vtanh.f32 %v1957_v48 }
 0x883   : > { %2718 = vtanh.f32 %v1968_v6 }
 0x88a   : > { %v2713_v17 = vpop.eup %2712 }
 0x88b   : > { %v2715_v8 = vpop.eup %2714  ;;  %v1961_v9 = vmul.f32 0.5, %v2713_v17 }
 0x88c   : > { %v1965_v10 = vmul.f32 0.5, %v2715_v8  ;;  %v2717_v12 = vpop.eup %2716 }
 0x88d   : > { %v1962_v11 = vadd.f32 0.5, %v1961_v9  ;;  %v2719_v0 = vpop.eup %2718 }
 0x88e   : > { %v1966_v18 = vadd.f32 0.5, %v1965_v10  ;;  %v1970_v22 = vmul.f32 0.5, %v2719_v0 }
 0x88f   : > { %v1973_v63 = vmul.f32 %v2717_v12, %v1962_v11 }
 0x890   : > { %v1972_v1 = vmul.f32 %v1966_v18, %v1857_v58  ;;  %v1971_v23 = vadd.f32 0.5, %v1970_v22 }
 0x892   : > { %v1974_v42 = vadd.f32 %v1973_v63, %v1972_v1 }
 0x894   : > { %2720 = vtanh.f32 %v1974_v42  ;;  %1981 = vst [vmem:[%s406_s16] sm:$0xff] %v1974_v42  ;;  %s2999_s16 = smov [#allocation10]  }
 0x895   : > { %s2846_s9 = sshll.u32 %s2999_s16, 4  ;;  %s2847_s9 = int_to_ptr.vmem [resolvable:$false] %s2846_s9 }
 0x896   : > { %p2849_p1 = scmp.lt.s32.totalorder %s3909_s0, %s2847_s9 }
 0x89e   : > { %v2721_v24 = vpop.eup %2720 }
 0x89f   : > { %v1976_v26 = vmul.f32 %v2721_v24, %v1971_v23 }
 0x8a1   : > { %1979 = vst [vmem:[%s1978_s11] sm:$0xff] %v1976_v26  ;;  %1980 = vst [vmem:[%s399_s29] sm:$0xff] %v1976_v26  ;;  %s2848_s11 = scalar_lea.vmem %s2847_s9, 256 }
 0x8a2   : > { %p2850_p4 = scmp.lt.s32.totalorder %s2848_s11, %s2842_s1 }
 0x8a4   : > { %p2851_p8 = por %p2850_p4, %p2849_p1 }
 0x8a6   : > { %p2852_p0 = pnand %p2851_p8, %p2845_p13 }
 0x8a8   : > { %2855 = shalt.err (!%p2852_p0)
}
 0x8a9   : > { %s2856_s27 = scalar_lea.hbm %s3907_s15, 128  ;;  %s2860_s8 = scalar_lea.hbm %s4020_s5, 256 }
 0x8aa   : > { %p2857_p11 = scmp.ne.s32.totalorder %s3907_s15, %s2856_s27  ;;  %p2861_p5 = scmp.lt.u32.totalorder %s3907_s15, %s4020_s5 }
 0x8ab   : > { %p2862_p6 = scmp.lt.u32.totalorder %s2860_s8, %s2856_s27  ;;  %p2864_p9 = scmp.lt.u32.totalorder %s2856_s27, %s3907_s15 }
 0x8ac   : > { %p2858_p3 = pnand %p2857_p11, %p4066_p7 }
 0x8ad   : > { %p2863_p2 = por %p2862_p6, %p2861_p5 }
 0x8ae   : > { %p2859_p10 = pneg %p2858_p3 }
 0x8af   : > { %p2865_p12 = por %p2864_p9, %p2863_p2 }
 0x8b1   : > { %p2866_p13 = pnand %p2865_p12, %p2859_p10 }
 0x8b3   : > { %2869 = shalt.err (!%p2866_p13)
}
 0x8b4   : > { %2455 = dma.vmem_to_hbm [thread:$0]  (%p4066_p7), %s3909_s0, 128, %s3907_s15, %s3920_s19  }
 0x8b5   : > { %s1983_s7 = scalar_lea.sflag [#allocation5], %s3243_s13  ;;  %s2870_s17 = scalar_lea.vmem %s3897_s28, 1024 }
 0x8b6   : > { %p2871_p1 = scmp.ne.s32.totalorder %s3897_s28, %s2870_s17  ;;  %s3000_s14 = smov [#allocation9]  }
 0x8b7   : > { %s2874_s1 = sshll.u32 %s3000_s14, 4  ;;  %s2875_s1 = int_to_ptr.vmem [resolvable:$false] %s2874_s1 }
 0x8b8   : > { %p2872_p4 = pnand %p2871_p1, %p4066_p7  ;;  %s2876_s16 = scalar_lea.vmem %s2875_s1, 2048 }
 0x8b9   : > { %p2877_p0 = scmp.lt.s32.totalorder %s3897_s28, %s2875_s1  ;;  %p2878_p11 = scmp.lt.s32.totalorder %s2876_s16, %s2870_s17 }
 0x8ba   : > { %p2873_p8 = pneg %p2872_p4 }
 0x8bb   : > { %p2879_p3 = por %p2878_p11, %p2877_p0 }
 0x8bd   : > { %p2880_p10 = pnand %p2879_p3, %p2873_p8 }
 0x8bf   : > { %2883 = shalt.err (!%p2880_p10)
}
 0x8c0   : > { %s2884_s0 = scalar_lea.hbm %s3902_s30, 1024  ;;  %s2888_s11 = scalar_lea.hbm %s4019_s4, 2048 }
 0x8c1   : > { %p2885_p5 = scmp.ne.s32.totalorder %s3902_s30, %s2884_s0  ;;  %p2889_p9 = scmp.lt.u32.totalorder %s3902_s30, %s4019_s4 }
 0x8c2   : > { %p2890_p12 = scmp.lt.u32.totalorder %s2888_s11, %s2884_s0  ;;  %p2892_p1 = scmp.lt.u32.totalorder %s2884_s0, %s3902_s30 }
 0x8c3   : > { %p2886_p6 = pnand %p2885_p5, %p4066_p7 }
 0x8c4   : > { %p2891_p13 = por %p2890_p12, %p2889_p9 }
 0x8c5   : > { %p2887_p2 = pneg %p2886_p6 }
 0x8c6   : > { %p2893_p4 = por %p2892_p1, %p2891_p13 }
 0x8c8   : > { %p2894_p8 = pnand %p2893_p4, %p2887_p2 }
 0x8ca   : > { %2897 = shalt.err (!%p2894_p8)
}
 0x8cb   : > { %s3001_s29 = smov 128   ;;  %s3002_s8 = smov 256  }
 0x8cc   : > { %s3003_s23 = smov 8   ;;  %s2898_s25 = scalar_lea.vmem %s3916_s24, 128 }
 0x8cd   : > { %2454 = dma.vmem_to_hbm [thread:$0]  (%p4066_p7), %s3897_s28, 1024, %s3902_s30, %s1983_s7, %s3001_s29, %s3002_s8, %s3003_s23  }
 0x8ce   : > { %p2899_p0 = scmp.ne.s32.totalorder %s3916_s24, %s2898_s25  ;;  %s3004_s17 = smov [#allocation12]  }
 0x8cf   : > { %s2902_s14 = sshll.u32 %s3004_s17, 4  ;;  %s2903_s14 = int_to_ptr.vmem [resolvable:$false] %s2902_s14 }
 0x8d0   : > { %p2900_p11 = pnand %p2899_p0, %p4066_p7  ;;  %s2904_s1 = scalar_lea.vmem %s2903_s14, 256 }
 0x8d1   : > { %p2905_p10 = scmp.lt.s32.totalorder %s3916_s24, %s2903_s14  ;;  %p2906_p5 = scmp.lt.s32.totalorder %s2904_s1, %s2898_s25 }
 0x8d2   : > { %p2901_p3 = pneg %p2900_p11 }
 0x8d3   : > { %p2907_p6 = por %p2906_p5, %p2905_p10 }
 0x8d5   : > { %p2908_p2 = pnand %p2907_p6, %p2901_p3 }
 0x8d7   : > { %2911 = shalt.err (!%p2908_p2)
}
 0x8d8   : > { %s2912_s13 = scalar_lea.hbm %s3914_s18, 128  ;;  %s2916_s7 = scalar_lea.hbm %s4021_s6, 256 }
 0x8d9   : > { %p2913_p9 = scmp.ne.s32.totalorder %s3914_s18, %s2912_s13  ;;  %p2917_p1 = scmp.lt.u32.totalorder %s3914_s18, %s4021_s6 }
 0x8da   : > { %p2918_p4 = scmp.lt.u32.totalorder %s2916_s7, %s2912_s13  ;;  %p2920_p0 = scmp.lt.u32.totalorder %s2912_s13, %s3914_s18 }
 0x8db   : > { %p2914_p12 = pnand %p2913_p9, %p4066_p7 }
 0x8dc   : > { %p2919_p8 = por %p2918_p4, %p2917_p1 }
 0x8dd   : > { %p2915_p13 = pneg %p2914_p12 }
 0x8de   : > { %p2921_p11 = por %p2920_p0, %p2919_p8 }
 0x8e0   : > { %p2922_p3 = pnand %p2921_p11, %p2915_p13 }
 0x8e2   : > { %2925 = shalt.err (!%p2922_p3)
}
 0x8e3   : > { %2456 = dma.vmem_to_hbm [thread:$0]  (%p4066_p7), %s3916_s24, 128, %s3914_s18, %s3920_s19  }
 0x8e4 PF: > { %s2052_s15 = sand.u32 1, %s2968_s21   ;;  %p4067_p10 = scmp.ne.s32.totalorder %s4047_s12, 0 }
 0x8e5   : > { %p4068_p5 = scmp.ge.s32.totalorder %s2988_s26, 2  ;;  %s2053_s9 = scalar_lea.sflag [#allocation5], %s2052_s15 }
 0x8e7   : > { %p2471_p6 = pnand %p4068_p5, %p4067_p10 }
 0x8e9   : > { %2959 = dma.done.wait (!%p2471_p6), %s2053_s9, 1024  }
 0x8ea   : > { %2961 = vsyncadd (!%p2471_p6), %s2053_s9, 4294966272  ;;  %s4069_s11 = sadd.s32 4294967294, %s2988_s26  }
 0x8eb   : > { %s2061_s27 = sand.u32 1, %s4069_s11  }
 0x8ec   : > { %s2062_s20 = scalar_lea.sflag [#allocation11], %s2061_s27 }
 0x8ed   : > { %2963 = dma.done.wait (!%p2471_p6), %s2062_s20, 256  }
 0x8ee   : > { %2965 = vsyncadd (!%p2471_p6), %s2062_s20, 4294967040  ;;  %s29_s26 = sadd.s32 1, %s2988_s26   ;;  %s4070_s10 = sld [smem:[#allocation17_spill]] }
 0x8ef   : > { %p26_p7 = scmp.ge.s32.totalorder %s29_s26, 4   ;;  %s4071_s23 = sld [smem:[#allocation20_spill]] }
 0x8f0   : > { %s4072_s24 = sld [smem:[#allocation18_spill]]  ;;  %s4073_s25 = sld [smem:[#allocation19_spill]] }
 0x8f1   : > { %s4074_s21 = smov %s2972_s22  ;;  %28 = sbr.rel (!%p26_p7) target bundleno = 13 (0xd), region = 160 }
 0x8f4   : > { %s4075_s22 = smov %s4070_s10 }
 0x8f8   :  { %2076 = vsyncpa [#allocation4], 1 }
 0x8f9   :  { %2078 = vsyncpa [#allocation4 + $0x1], 1 }
 0x8fa   :  { %2079 = vsyncpa [#allocation7], 1 }
 0x8fb   :  { %2081 = vsyncpa [#allocation7 + $0x1], 1 }
 0x8fc   :  { %2082 = vsyncpa [#allocation5], 1 }
 0x8fd   :  { %2084 = vsyncpa [#allocation5 + $0x1], 1 }
 0x8fe   :  { %2085 = vsyncpa [#allocation11], 1 }
 0x8ff   :  { %2087 = vsyncpa [#allocation11 + $0x1], 1 }

</bundles_post_ra>
